<compile_context>
chip_gen: v7x
topology: tpu7x:2x2x1
jax: 0.10.0
libtpu: 0.0.40
codegen_flags: <defaults>
</compile_context>

<pallas_src>
import functools

import jax
import jax.numpy as jnp
from jax.experimental import pallas as pl
from jax.experimental.pallas import tpu as pltpu


def _trpo_mlp_kernel(x_ref, w1_ref, b1_ref, w2_ref, b2_ref, w3_ref, b3_ref,
                     out_ref):
    # Layer 1: Linear (f32 MXU, f32 accumulate) + bias + ReLU.
    h1 = jnp.dot(x_ref[...], w1_ref[...],
                 preferred_element_type=jnp.float32) + b1_ref[...]
    h1 = jnp.maximum(h1, 0.0)
    # Layer 2: Linear + ReLU.
    h2 = jnp.dot(h1, w2_ref[...],
                 preferred_element_type=jnp.float32) + b2_ref[...]
    h2 = jnp.maximum(h2, 0.0)
    # Layer 3: Linear + numerically-stable softmax along last dim.
    logits = jnp.dot(h2, w3_ref[...],
                     preferred_element_type=jnp.float32) + b3_ref[...]
    m = jnp.max(logits, axis=-1, keepdims=True)
    e = jnp.exp(logits - m)
    denom = jnp.sum(e, axis=-1, keepdims=True)
    # Approx reciprocal on the EUP (free slot) + one Newton step on the VPU
    # (also free: kernel is overhead-bound) -> row sums correct to ~1e-6.
    r = pl.reciprocal(denom, approx=True)
    r = r * (2.0 - denom * r)
    out_ref[...] = (e * r).astype(out_ref.dtype)


@functools.partial(jax.jit, static_argnames=("batch_tile",))
def trpo_forward(x, w1_t, b1, w2_t, b2, w3_t, b3, batch_tile=256):
    """Runs the full 3-layer MLP + softmax in a single Pallas kernel.

    x      : (B, num_inputs) float32
    w1_t   : (num_inputs, 128), b1: (1, 128)
    w2_t   : (128, 64),         b2: (1, 64)
    w3_t   : (64, num_outputs), b3: (1, num_outputs)
    returns: (B, num_outputs) float32 softmax probabilities.
    """
    assert batch_tile % 8 == 0, "batch_tile must be a multiple of 8 (f32 sublane)"
    B, num_inputs = x.shape
    num_outputs = w3_t.shape[1]

    # Tile selection: for small B take the whole (8-aligned) batch in one
    # step (no pad beyond sublane alignment); otherwise use batch_tile rows
    # per step and only pad as a fallback for ragged batches.
    b_aligned = ((B + 7) // 8) * 8
    if b_aligned <= batch_tile:
        bt = b_aligned
    else:
        bt = batch_tile
    B_pad = pl.cdiv(B, bt) * bt
    if B_pad != B:
        # Fallback only; the common path (B multiple of bt) skips this HBM pass.
        x = jnp.pad(x, ((0, B_pad - B), (0, 0)))

    x = x.astype(jnp.float32)
    w1_t = w1_t.astype(jnp.float32)
    w2_t = w2_t.astype(jnp.float32)
    w3_t = w3_t.astype(jnp.float32)
    b1 = b1.astype(jnp.float32)
    b2 = b2.astype(jnp.float32)
    b3 = b3.astype(jnp.float32)

    grid = (B_pad // bt,)
    full = lambda i: (0, 0)  # weights/biases are small: keep fully resident

    flops = 2 * B_pad * (num_inputs * 128 + 128 * 64 + 64 * num_outputs)
    transcendentals = B_pad * (num_outputs + 1)  # exp rows + reciprocal
    bytes_accessed = (B_pad * num_inputs * 4                       # x (f32)
                      + B_pad * num_outputs * 4                    # out (f32)
                      + (num_inputs * 128 + 128 * 64 + 64 * num_outputs) * 4
                      + (128 + 64 + num_outputs) * 4)              # biases

    out = pl.pallas_call(
        _trpo_mlp_kernel,
        out_shape=jax.ShapeDtypeStruct((B_pad, num_outputs), jnp.float32),
        grid_spec=pltpu.PrefetchScalarGridSpec(
            num_scalar_prefetch=0,
            grid=grid,
            in_specs=[
                pl.BlockSpec((bt, num_inputs), lambda i: (i, 0)),  # x tile
                pl.BlockSpec(w1_t.shape, full),
                pl.BlockSpec(b1.shape, full),
                pl.BlockSpec(w2_t.shape, full),
                pl.BlockSpec(b2.shape, full),
                pl.BlockSpec(w3_t.shape, full),
                pl.BlockSpec(b3.shape, full),
            ],
            out_specs=pl.BlockSpec((bt, num_outputs), lambda i: (i, 0)),
        ),
        compiler_params=pltpu.CompilerParams(
            dimension_semantics=("parallel",)),   # v7x: shard batch over 2 TCs
        cost_estimate=pl.CostEstimate(
            flops=flops,
            transcendentals=transcendentals,
            bytes_accessed=bytes_accessed),
    )(x, w1_t, b1, w2_t, b2, w3_t, b3)

    return out[:B]


def xavier_uniform(key, shape):
    """Matches torch.nn.init.xavier_uniform_ for a Linear weight (out, in)."""
    fan_out, fan_in = shape
    limit = jnp.sqrt(6.0 / (fan_in + fan_out))
    return jax.random.uniform(key, shape, jnp.float32, -limit, limit)


def linear_bias_init(key, fan_in, out_features):
    """Matches PyTorch default Linear bias init: U(-1/sqrt(fan_in), +)."""
    bound = 1.0 / jnp.sqrt(jnp.float32(fan_in))
    return jax.random.uniform(key, (1, out_features), jnp.float32, -bound, bound)


def _reference_forward(x, w1, b1, w2, b2, w3, b3):
    """Pure-JAX f32 reference matching the PyTorch forward."""
    h1 = jnp.maximum(x @ w1.T + b1, 0.0)
    h2 = jnp.maximum(h1 @ w2.T + b2, 0.0)
    logits = h2 @ w3.T + b3
    return jax.nn.softmax(logits, axis=-1)


if __name__ == "__main__":
    # Small problem consistent with the module's forward: (batch, num_inputs).
    # batch=512 -> 2 grid steps of the 256-row tile (keeps both v7x TCs busy,
    # only 2 serial steps on v5e/v6e).
    num_inputs = 32
    num_outputs = 8
    batch = 512

    key = jax.random.PRNGKey(0)
    k_x, k_w1, k_b1, k_w2, k_b2, k_w3, k_b3 = jax.random.split(key, 7)

    x = jax.random.normal(k_x, (batch, num_inputs), jnp.float32)

    # Parameters (deterministic, synthetic): fc_1, fc_2, fc_3 (PyTorch (out,in)).
    w1 = xavier_uniform(k_w1, (128, num_inputs))
    b1 = linear_bias_init(k_b1, num_inputs, 128)
    w2 = xavier_uniform(k_w2, (64, 128))
    b2 = linear_bias_init(k_b2, 128, 64)
    w3 = xavier_uniform(k_w3, (num_outputs, 64))
    b3 = linear_bias_init(k_b3, 64, num_outputs)

    # Pre-transpose weights for x @ W.T semantics inside the kernel.
    policy = trpo_forward(x, w1.T, b1, w2.T, b2, w3.T, b3)
    policy = jax.block_until_ready(policy)

    # Sanity: valid Categorical parameters. f32 matmuls + Newton-refined
    # reciprocal keep the result very close to the pure-JAX reference.
    assert policy.shape == (batch, num_outputs)
    row_sums = jnp.sum(policy, axis=-1)
    assert bool(jnp.all(jnp.abs(row_sums - 1.0) < 1e-4))
    assert bool(jnp.all(policy >= 0.0))

    ref = _reference_forward(x, w1, b1, w2, b2, w3, b3)
    max_err = float(jnp.max(jnp.abs(policy - ref)))
    assert max_err < 1e-4, f"max abs error vs f32 reference too large: {max_err}"

    # TODO(synk): the PyTorch module wraps the probabilities in a
    # torch.distributions.Categorical object; sampling/log_prob is host-side
    # logic and is not part of the kernel.
    print("KERNEL_OK")
</pallas_src>

<mosaic_0001>
module attributes {stable_mosaic.version = 11 : i64} {
  func.func @_trpo_mlp_kernel(%arg0: i32, %arg1: memref<256x32xf32, #tpu.memory_space<vmem>>, %arg2: memref<32x128xf32, #tpu.memory_space<vmem>>, %arg3: memref<1x128xf32, #tpu.memory_space<vmem>>, %arg4: memref<128x64xf32, #tpu.memory_space<vmem>>, %arg5: memref<1x64xf32, #tpu.memory_space<vmem>>, %arg6: memref<64x8xf32, #tpu.memory_space<vmem>>, %arg7: memref<1x8xf32, #tpu.memory_space<vmem>>, %arg8: memref<256x8xf32, #tpu.memory_space<vmem>>) attributes {dimension_semantics = [#tpu.dimension_semantics<parallel>], iteration_bounds = array<i64: 2>, scalar_prefetch = 0 : i64, scratch_operands = 0 : i64, tpu.core_type = #tpu.core_type<tc>, window_params = [{transform_indices = @transform_0, window_bounds = array<i64: 256, 32>}, {pipeline_mode = #tpu.pipeline_mode<synchronous>, transform_indices = @transform_1, window_bounds = array<i64: 32, 128>}, {pipeline_mode = #tpu.pipeline_mode<synchronous>, transform_indices = @transform_2, window_bounds = array<i64: 1, 128>}, {pipeline_mode = #tpu.pipeline_mode<synchronous>, transform_indices = @transform_3, window_bounds = array<i64: 128, 64>}, {pipeline_mode = #tpu.pipeline_mode<synchronous>, transform_indices = @transform_4, window_bounds = array<i64: 1, 64>}, {pipeline_mode = #tpu.pipeline_mode<synchronous>, transform_indices = @transform_5, window_bounds = array<i64: 64, 8>}, {pipeline_mode = #tpu.pipeline_mode<synchronous>, transform_indices = @transform_6, window_bounds = array<i64: 1, 8>}, {transform_indices = @transform_7, window_bounds = array<i64: 256, 8>}]} {
    %c0 = arith.constant 0 : index
    %c0_0 = arith.constant 0 : index
    %0 = vector.load %arg1[%c0, %c0_0] : memref<256x32xf32, #tpu.memory_space<vmem>>, vector<256x32xf32>
    %c0_1 = arith.constant 0 : index
    %c0_2 = arith.constant 0 : index
    %1 = vector.load %arg2[%c0_1, %c0_2] : memref<32x128xf32, #tpu.memory_space<vmem>>, vector<32x128xf32>
    %cst = arith.constant dense<0.000000e+00> : vector<256x128xf32>
    %2 = tpu.matmul %0, %1, %cst {dimension_numbers = #tpu.dot_dimension_numbers<[1], [0], [0], [1], [0, 0, 1, 1], [], []>} : vector<256x32xf32>, vector<32x128xf32>, vector<256x128xf32> -> vector<256x128xf32>
    %c0_3 = arith.constant 0 : index
    %c0_4 = arith.constant 0 : index
    %3 = vector.load %arg3[%c0_3, %c0_4] : memref<1x128xf32, #tpu.memory_space<vmem>>, vector<1x128xf32>
    %4 = vector.broadcast %3 : vector<1x128xf32> to vector<256x128xf32>
    %5 = arith.addf %2, %4 : vector<256x128xf32>
    %cst_5 = arith.constant 0.000000e+00 : f32
    %6 = vector.broadcast %cst_5 : f32 to vector<256x128xf32>
    %7 = arith.maximumf %5, %6 : vector<256x128xf32>
    %c0_6 = arith.constant 0 : index
    %c0_7 = arith.constant 0 : index
    %8 = vector.load %arg4[%c0_6, %c0_7] : memref<128x64xf32, #tpu.memory_space<vmem>>, vector<128x64xf32>
    %cst_8 = arith.constant dense<0.000000e+00> : vector<256x64xf32>
    %9 = tpu.matmul %7, %8, %cst_8 {dimension_numbers = #tpu.dot_dimension_numbers<[1], [0], [0], [1], [0, 0, 1, 1], [], []>} : vector<256x128xf32>, vector<128x64xf32>, vector<256x64xf32> -> vector<256x64xf32>
    %c0_9 = arith.constant 0 : index
    %c0_10 = arith.constant 0 : index
    %10 = vector.load %arg5[%c0_9, %c0_10] : memref<1x64xf32, #tpu.memory_space<vmem>>, vector<1x64xf32>
    %11 = vector.broadcast %10 : vector<1x64xf32> to vector<256x64xf32>
    %12 = arith.addf %9, %11 : vector<256x64xf32>
    %cst_11 = arith.constant 0.000000e+00 : f32
    %13 = vector.broadcast %cst_11 : f32 to vector<256x64xf32>
    %14 = arith.maximumf %12, %13 : vector<256x64xf32>
    %c0_12 = arith.constant 0 : index
    %c0_13 = arith.constant 0 : index
    %15 = vector.load %arg6[%c0_12, %c0_13] : memref<64x8xf32, #tpu.memory_space<vmem>>, vector<64x8xf32>
    %cst_14 = arith.constant dense<0.000000e+00> : vector<256x8xf32>
    %16 = tpu.matmul %14, %15, %cst_14 {dimension_numbers = #tpu.dot_dimension_numbers<[1], [0], [0], [1], [0, 0, 1, 1], [], []>} : vector<256x64xf32>, vector<64x8xf32>, vector<256x8xf32> -> vector<256x8xf32>
    %c0_15 = arith.constant 0 : index
    %c0_16 = arith.constant 0 : index
    %17 = vector.load %arg7[%c0_15, %c0_16] : memref<1x8xf32, #tpu.memory_space<vmem>>, vector<1x8xf32>
    %18 = vector.broadcast %17 : vector<1x8xf32> to vector<256x8xf32>
    %19 = arith.addf %16, %18 : vector<256x8xf32>
    %cst_17 = arith.constant dense<0xFF800000> : vector<256xf32>
    %20 = vector.multi_reduction <maximumf>, %19, %cst_17 [1] : vector<256x8xf32> to vector<256xf32>
    %21 = vector.shape_cast %20 : vector<256xf32> to vector<256x1xf32>
    %22 = vector.broadcast %21 : vector<256x1xf32> to vector<256x8xf32>
    %23 = arith.subf %19, %22 : vector<256x8xf32>
    %24 = math.exp %23 : vector<256x8xf32>
    %cst_18 = arith.constant dense<0.000000e+00> : vector<256xf32>
    %25 = vector.multi_reduction <add>, %24, %cst_18 [1] : vector<256x8xf32> to vector<256xf32>
    %26 = vector.shape_cast %25 : vector<256xf32> to vector<256x1xf32>
    %27 = tpu.reciprocal %26 {approx = true} : vector<256x1xf32> -> vector<256x1xf32>
    %28 = arith.mulf %26, %27 : vector<256x1xf32>
    %cst_19 = arith.constant 2.000000e+00 : f32
    %29 = vector.broadcast %cst_19 : f32 to vector<256x1xf32>
    %30 = arith.subf %29, %28 : vector<256x1xf32>
    %31 = arith.mulf %27, %30 : vector<256x1xf32>
    %32 = vector.broadcast %31 : vector<256x1xf32> to vector<256x8xf32>
    %33 = arith.mulf %24, %32 : vector<256x8xf32>
    %c0_20 = arith.constant 0 : index
    %c0_21 = arith.constant 0 : index
    %34 = vector.load %arg8[%c0_20, %c0_21] : memref<256x8xf32, #tpu.memory_space<vmem>>, vector<256x8xf32>
    tpu.vector_store %arg8[%c0_20, %c0_21], %33 {strides = array<i32>} : memref<256x8xf32, #tpu.memory_space<vmem>>, vector<256x8xf32>,
    return
  }
  func.func @transform_0(%arg0: i32) -> (i32, i32) {
    %c0_i32 = arith.constant 0 : i32
    %c0_i32_0 = arith.constant 0 : i32
    return %arg0, %c0_i32 : i32, i32
  }
  func.func @transform_1(%arg0: i32) -> (i32, i32) {
    %c0_i32 = arith.constant 0 : i32
    %c0_i32_0 = arith.constant 0 : i32
    %c0_i32_1 = arith.constant 0 : i32
    return %c0_i32, %c0_i32_0 : i32, i32
  }
  func.func @transform_2(%arg0: i32) -> (i32, i32) {
    %c0_i32 = arith.constant 0 : i32
    %c0_i32_0 = arith.constant 0 : i32
    %c0_i32_1 = arith.constant 0 : i32
    return %c0_i32, %c0_i32_0 : i32, i32
  }
  func.func @transform_3(%arg0: i32) -> (i32, i32) {
    %c0_i32 = arith.constant 0 : i32
    %c0_i32_0 = arith.constant 0 : i32
    %c0_i32_1 = arith.constant 0 : i32
    return %c0_i32, %c0_i32_0 : i32, i32
  }
  func.func @transform_4(%arg0: i32) -> (i32, i32) {
    %c0_i32 = arith.constant 0 : i32
    %c0_i32_0 = arith.constant 0 : i32
    %c0_i32_1 = arith.constant 0 : i32
    return %c0_i32, %c0_i32_0 : i32, i32
  }
  func.func @transform_5(%arg0: i32) -> (i32, i32) {
    %c0_i32 = arith.constant 0 : i32
    %c0_i32_0 = arith.constant 0 : i32
    %c0_i32_1 = arith.constant 0 : i32
    return %c0_i32, %c0_i32_0 : i32, i32
  }
  func.func @transform_6(%arg0: i32) -> (i32, i32) {
    %c0_i32 = arith.constant 0 : i32
    %c0_i32_0 = arith.constant 0 : i32
    %c0_i32_1 = arith.constant 0 : i32
    return %c0_i32, %c0_i32_0 : i32, i32
  }
  func.func @transform_7(%arg0: i32) -> (i32, i32) {
    %c0_i32 = arith.constant 0 : i32
    %c0_i32_0 = arith.constant 0 : i32
    return %arg0, %c0_i32 : i32, i32
  }
}

</mosaic_0001>

<bundles_post_ra>
// kernel: trpo_forward.1
= control target key start
LH: loop header
LB: loop body
LE: loop exit
PB: predicated region body
PF: predicated region fallthrough
CT: control target
= control target key end

     0   :  { %s2479_s24 = smov 0   ;;  %s3194_s0 = inlined_call_operand.vmem [shape: f32[512,32], index: 0, kind: input, shape index: {}]   ;;  %s3195_s1 = inlined_call_operand.vmem [shape: f32[32,128], index: 1, kind: input, shape index: {}]   ;;  %s3196_s2 = inlined_call_operand.vmem [shape: f32[1,128], index: 2, kind: input, shape index: {}]   ;;  %s3197_s3 = inlined_call_operand.vmem [shape: f32[128,64], index: 3, kind: input, shape index: {}]   ;;  %s3198_s4 = inlined_call_operand.vmem [shape: f32[1,64], index: 4, kind: input, shape index: {}]   ;;  %s3199_s5 = inlined_call_operand.vmem [shape: f32[64,8], index: 5, kind: input, shape index: {}]   ;;  %s3200_s6 = inlined_call_operand.vmem [shape: f32[1,8], index: 6, kind: input, shape index: {}]   ;;  %s3201_s7 = inlined_call_operand.vmem [shape: f32[512,8], index: 7, kind: output, shape index: {}]  }
   0x1 LB: > { %s1833_s25 = sadd.s32 4294967295, %s2437_s24   ;;  %p1837_p0 = scmp.ge.s32.totalorder %s2437_s24, 1  ;;  %s2437_s24 = sphi %s2479_s24, %s17_s24  }
   0x2   : > { %p238_p1 = scmp.lt.s32.totalorder %s2437_s24, 3 }
   0x4   : > { %p239_p2 = pnand %p1837_p0, %p238_p1 }
   0x5   : > { %v314_v0 = vld [vmem:[%s3195_s1] sm:$0xff] (!%p239_p2)  ;;  %v315_v1 = vld [vmem:[%s3195_s1 + $0x8] sm:$0xff] (!%p239_p2)  ;;  %v316_v2 = vld [vmem:[%s3195_s1 + $0x10] sm:$0xff] (!%p239_p2)  ;;  %s1838_s9 = sshll.u32 (!%p239_p2), %s1833_s25, 5  ;;  %vm325_vm0 = vcmask (!%p239_p2), 261120   ;;  %vm974_vm1 = vcmask (!%p239_p2), 523264  }
   0x6   : > { %242 = sbr.rel (%p239_p2) target bundleno = 1054 (0x41e), region = 48  ;;  %v2235_v3 = vpack.c.bf16 (!%p239_p2), %v315_v1, %v314_v0  ;;  %v317_v4 = vld [vmem:[%s3195_s1 + $0x18] sm:$0xff] (!%p239_p2)  ;;  %p271_p3 = scmp.lt.s32.totalorder (!%p239_p2), %s1838_s9, 63  ;;  %v679_v6 = vld [vmem:[%s3197_s3] sm:$0xff] (!%p239_p2)  ;;  %v680_v7 = vld [vmem:[%s3197_s3 + $0x8] sm:$0xff] (!%p239_p2)  ;;  %vm1296_vm2 = vcmask (!%p239_p2), 64512  }
   0x7   : > { %v2239_v5 = vpack.c.bf16 (!%p239_p2), %v317_v4, %v316_v2  ;;  %v2243_v8 = vpack.c.bf16 (!%p239_p2), %v680_v7, %v679_v6  ;;  %v681_v12 = vld [vmem:[%s3197_s3 + $0x10] sm:$0xff] (!%p239_p2)  ;;  %v682_v13 = vld [vmem:[%s3197_s3 + $0x18] sm:$0xff] (!%p239_p2)  ;;  %v683_v20 = vld [vmem:[%s3197_s3 + $0x20] sm:$0xff] (!%p239_p2) }
   0x8   : > { %2236 = vmatprep.subr.bf16.mxu0 (!%p239_p2), %v2235_v3  ;;  %2291 = vmatprep.subr.bf16.mxu1 (!%p239_p2), %v2235_v3  ;;  %v2247_v19 = vpack.c.bf16 (!%p239_p2), %v682_v13, %v681_v12  ;;  %v684_v21 = vld [vmem:[%s3197_s3 + $0x28] sm:$0xff] (!%p239_p2)  ;;  %v685_v27 = vld [vmem:[%s3197_s3 + $0x30] sm:$0xff] (!%p239_p2)  ;;  %v686_v28 = vld [vmem:[%s3197_s3 + $0x38] sm:$0xff] (!%p239_p2) }
   0x9   : > { %2238 = vmatpush3.bf16.msra.mxu0 (!%p239_p2), %v2235_v3  ;;  %2293 = vmatpush3.bf16.msra.mxu1 (!%p239_p2), %v2235_v3  ;;  %v2251_v26 = vpack.c.bf16 (!%p239_p2), %v684_v21, %v683_v20  ;;  %v2255_v33 = vpack.c.bf16 (!%p239_p2), %v686_v28, %v685_v27  ;;  %v687_v34 = vld [vmem:[%s3197_s3 + $0x40] sm:$0xff] (!%p239_p2)  ;;  %v688_v35 = vld [vmem:[%s3197_s3 + $0x48] sm:$0xff] (!%p239_p2)  ;;  %v689_v41 = vld [vmem:[%s3197_s3 + $0x50] sm:$0xff] (!%p239_p2) }
   0xa   : > { %2240 = vmatprep.subr.bf16.mxu0 (!%p239_p2), %v2239_v5  ;;  %2292 = vmatprep.subr.bf16.mxu1 (!%p239_p2), %v2239_v5  ;;  %v2259_v40 = vpack.c.bf16 (!%p239_p2), %v688_v35, %v687_v34  ;;  %v690_v42 = vld [vmem:[%s3197_s3 + $0x58] sm:$0xff] (!%p239_p2)  ;;  %v691_v48 = vld [vmem:[%s3197_s3 + $0x60] sm:$0xff] (!%p239_p2)  ;;  %v692_v49 = vld [vmem:[%s3197_s3 + $0x68] sm:$0xff] (!%p239_p2) }
   0xb   : > { %v2263_v47 = vpack.c.bf16 (!%p239_p2), %v690_v42, %v689_v41  ;;  %v2267_v54 = vpack.c.bf16 (!%p239_p2), %v692_v49, %v691_v48  ;;  %v693_v59 = vld [vmem:[%s3197_s3 + $0x70] sm:$0xff] (!%p239_p2)  ;;  %v694_v60 = vld [vmem:[%s3197_s3 + $0x78] sm:$0xff] (!%p239_p2)  ;;  %v959_v62 = vld [vmem:[%s3199_s5] sm:$0xff] (!%p239_p2) }
   0xc   : > { %v2271_v61 = vpack.c.bf16 (!%p239_p2), %v694_v60, %v693_v59  ;;  %v960_v63 = vld [vmem:[%s3199_s5 + $0x8] sm:$0xff] (!%p239_p2)  ;;  %v961_v0 = vld [vmem:[%s3199_s5 + $0x10] sm:$0xff] (!%p239_p2)  ;;  %v962_v2 = vld [vmem:[%s3199_s5 + $0x18] sm:$0xff] (!%p239_p2) }
   0xd   : > { %s3203_s9 = smov (!%p271_p3, %s1838_s9), 63  ;;  %2242 = vmatpush3.bf16.msra.mxu0 %v2239_v5  ;;  %2294 = vmatpush3.bf16.msra.mxu1 %v2239_v5  ;;  %v2275_v1 = vpack.c.bf16 %v960_v63, %v959_v62  ;;  %v2279_v3 = vpack.c.bf16 %v962_v2, %v961_v0  ;;  %v963_v4 = vld [vmem:[%s3199_s5 + $0x20] sm:$0xff]  ;;  %v964_v5 = vld [vmem:[%s3199_s5 + $0x28] sm:$0xff]  ;;  %v965_v7 = vld [vmem:[%s3199_s5 + $0x30] sm:$0xff] }
   0xe   : > { %s1839_s16 = sshll.u32 %s3203_s9, 3  ;;  %2244 = vmatprep.subr.bf16.mxu1 %v2243_v8  ;;  %v2283_v6 = vpack.c.bf16 %v964_v5, %v963_v4 }
   0xf   : > { %s2513_s19 = scalar_lea.vmem %s3194_s0, %s1839_s16  ;;  %2276 = vmatprep.subr.bf16.mxu0 %v2275_v1  ;;  %s3093_s11 = scalar_lea.vmem %s3201_s7, %s1839_s16 }
  0x10   : > { %v282_v9 = vld [vmem:[%s2513_s19] sm:$0xff]  ;;  %v283_v10 = vld [vmem:[%s2513_s19 + $0x8] sm:$0xff]  ;;  %v284_v11 = vld [vmem:[%s2513_s19 + $0x10] sm:$0xff] }
  0x11   : > { %2043 = vmatprep.mubr.msk.f32.mxu0 %vm325_vm0, %v282_v9  ;;  %v285_v14 = vld [vmem:[%s2513_s19 + $0x18] sm:$0xff]  ;;  %v298_v15 = vld [vmem:[%s2513_s19 + $0x80] sm:$0xff]  ;;  %v299_v16 = vld [vmem:[%s2513_s19 + $0x88] sm:$0xff] }
  0x12   : > { %2044 = vmatmul.mubr.msk.f32.vlgmr.msra.gmra.mrb[0].mxu0 %vm325_vm0, %v283_v10  ;;  %v286_v17 = vld [vmem:[%s2513_s19 + $0x20] sm:$0xff]  ;;  %2067 = vmatprep.mubr.msk.f32.mxu1 %vm325_vm0, %v298_v15  ;;  %v300_v18 = vld [vmem:[%s2513_s19 + $0x90] sm:$0xff]  ;;  %v301_v22 = vld [vmem:[%s2513_s19 + $0x98] sm:$0xff] }
  0x13   : > { %2046 = vmatprep.mubr.msk.f32.mxu0 %vm325_vm0, %v284_v11  ;;  %2068 = vmatmul.mubr.msk.f32.vlgmr.msra.gmra.mrb[0].mxu1 %vm325_vm0, %v299_v16  ;;  %v287_v23 = vld [vmem:[%s2513_s19 + $0x28] sm:$0xff]  ;;  %v302_v24 = vld [vmem:[%s2513_s19 + $0xa0] sm:$0xff]  ;;  %v288_v25 = vld [vmem:[%s2513_s19 + $0x30] sm:$0xff] }
  0x14   : > { %2070 = vmatprep.mubr.msk.f32.mxu1 %vm325_vm0, %v300_v18  ;;  %2246 = vmatpush3.bf16.msra.mxu1 %v2243_v8  ;;  %v303_v29 = vld [vmem:[%s2513_s19 + $0xa8] sm:$0xff]  ;;  %v289_v30 = vld [vmem:[%s2513_s19 + $0x38] sm:$0xff]  ;;  %v304_v31 = vld [vmem:[%s2513_s19 + $0xb0] sm:$0xff] }
  0x15   : > { %2248 = vmatprep.subr.bf16.mxu1 %v2247_v19  ;;  %v290_v32 = vld [vmem:[%s2513_s19 + $0x40] sm:$0xff]  ;;  %v305_v36 = vld [vmem:[%s2513_s19 + $0xb8] sm:$0xff]  ;;  %v291_v37 = vld [vmem:[%s2513_s19 + $0x48] sm:$0xff]  ;;  %2278 = vmatpush3.bf16.msra.mxu0 %v2275_v1 }
  0x16   : > { %2047 = vmatmul.mubr.msk.f32.gmra.mrb[2].mxu0 %vm325_vm0, %v285_v14  ;;  %v306_v38 = vld [vmem:[%s2513_s19 + $0xc0] sm:$0xff]  ;;  %v292_v39 = vld [vmem:[%s2513_s19 + $0x50] sm:$0xff]  ;;  %v307_v43 = vld [vmem:[%s2513_s19 + $0xc8] sm:$0xff]  ;;  %2280 = vmatprep.subr.bf16.mxu0 %v2279_v3 }
  0x17   : > { %2049 = vmatprep.mubr.msk.f32.mxu0 %vm325_vm0, %v286_v17  ;;  %2071 = vmatmul.mubr.msk.f32.gmra.mrb[2].mxu1 %vm325_vm0, %v301_v22  ;;  %v293_v44 = vld [vmem:[%s2513_s19 + $0x58] sm:$0xff]  ;;  %v308_v45 = vld [vmem:[%s2513_s19 + $0xd0] sm:$0xff]  ;;  %v294_v46 = vld [vmem:[%s2513_s19 + $0x60] sm:$0xff] }
  0x18   : > { %2073 = vmatprep.mubr.msk.f32.mxu1 %vm325_vm0, %v302_v24  ;;  %2250 = vmatpush3.bf16.msra.mxu1 %v2247_v19  ;;  %v309_v50 = vld [vmem:[%s2513_s19 + $0xd8] sm:$0xff]  ;;  %v295_v51 = vld [vmem:[%s2513_s19 + $0x68] sm:$0xff]  ;;  %v310_v52 = vld [vmem:[%s2513_s19 + $0xe0] sm:$0xff] }
  0x19   : > { %2252 = vmatprep.subr.bf16.mxu1 %v2251_v26  ;;  %v296_v53 = vld [vmem:[%s2513_s19 + $0x70] sm:$0xff]  ;;  %v311_v55 = vld [vmem:[%s2513_s19 + $0xe8] sm:$0xff]  ;;  %v297_v56 = vld [vmem:[%s2513_s19 + $0x78] sm:$0xff]  ;;  %2282 = vmatpush3.bf16.msra.mxu0 %v2279_v3 }
  0x1a   : > { %2050 = vmatmul.mubr.msk.f32.gmra.mrb[4].mxu0 %vm325_vm0, %v287_v23  ;;  %v312_v57 = vld [vmem:[%s2513_s19 + $0xf0] sm:$0xff]  ;;  %v313_v58 = vld [vmem:[%s2513_s19 + $0xf8] sm:$0xff]  ;;  %2284 = vmatprep.subr.bf16.mxu0 %v2283_v6  ;;  %v2648_v10 = vld [vmem:[%s3196_s2] ss:$0 sm:$0xff] }
  0x1b   : > { %2052 = vmatprep.mubr.msk.f32.mxu0 %vm325_vm0, %v288_v25  ;;  %2074 = vmatmul.mubr.msk.f32.gmra.mrb[4].mxu1 %vm325_vm0, %v303_v29  ;;  %v966_v8 = vld [vmem:[%s3199_s5 + $0x38] sm:$0xff] }
  0x1c   : > { %2076 = vmatprep.mubr.msk.f32.mxu1 %vm325_vm0, %v304_v31  ;;  %2254 = vmatpush3.bf16.msra.mxu1 %v2251_v26  ;;  %v2287_v9 = vpack.c.bf16 %v966_v8, %v965_v7 }
  0x1d   : > { %2256 = vmatprep.subr.bf16.mxu1 %v2255_v33  ;;  %2286 = vmatpush3.bf16.msra.mxu0 %v2283_v6 }
  0x1e   : > { %2053 = vmatmul.mubr.msk.f32.gmra.mrb[6].mxu0 %vm325_vm0, %v289_v30  ;;  %2288 = vmatprep.subr.bf16.mxu0 %v2287_v9 }
  0x1f   : > { %2055 = vmatprep.mubr.msk.f32.mxu0 %vm325_vm0, %v290_v32  ;;  %2077 = vmatmul.mubr.msk.f32.gmra.mrb[6].mxu1 %vm325_vm0, %v305_v36 }
  0x20   : > { %2079 = vmatprep.mubr.msk.f32.mxu1 %vm325_vm0, %v306_v38  ;;  %2258 = vmatpush3.bf16.msra.mxu1 %v2255_v33 }
  0x21   : > { %2260 = vmatprep.subr.bf16.mxu1 %v2259_v40  ;;  %2290 = vmatpush3.bf16.msra.mxu0 %v2287_v9 }
  0x22   : > { %2056 = vmatmul.mubr.msk.f32.gmra.mrb[8].mxu0 %vm325_vm0, %v291_v37 }
  0x23   : > { %2058 = vmatprep.mubr.msk.f32.mxu0 %vm325_vm0, %v292_v39  ;;  %2080 = vmatmul.mubr.msk.f32.gmra.mrb[8].mxu1 %vm325_vm0, %v307_v43 }
  0x24   : > { %2082 = vmatprep.mubr.msk.f32.mxu1 %vm325_vm0, %v308_v45  ;;  %2262 = vmatpush3.bf16.msra.mxu1 %v2259_v40 }
  0x25   : > { %2264 = vmatprep.subr.bf16.mxu1 %v2263_v47 }
  0x26   : > { %2059 = vmatmul.mubr.msk.f32.gmra.mrb[10].mxu0 %vm325_vm0, %v293_v44 }
  0x27   : > { %2061 = vmatprep.mubr.msk.f32.mxu0 %vm325_vm0, %v294_v46  ;;  %2083 = vmatmul.mubr.msk.f32.gmra.mrb[10].mxu1 %vm325_vm0, %v309_v50 }
  0x28   : > { %2085 = vmatprep.mubr.msk.f32.mxu1 %vm325_vm0, %v310_v52  ;;  %2266 = vmatpush3.bf16.msra.mxu1 %v2263_v47 }
  0x29   : > { %2268 = vmatprep.subr.bf16.mxu1 %v2267_v54 }
  0x2a   : > { %2062 = vmatmul.mubr.msk.f32.gmra.mrb[12].mxu0 %vm325_vm0, %v295_v51 }
  0x2b   : > { %2064 = vmatprep.mubr.msk.f32.mxu0 %vm325_vm0, %v296_v53  ;;  %2086 = vmatmul.mubr.msk.f32.gmra.mrb[12].mxu1 %vm325_vm0, %v311_v55 }
  0x2c   : > { %2088 = vmatprep.mubr.msk.f32.mxu1 %vm325_vm0, %v312_v57  ;;  %2270 = vmatpush3.bf16.msra.mxu1 %v2267_v54 }
  0x2d   : > { %2272 = vmatprep.subr.bf16.mxu1 %v2271_v61 }
  0x2e   : > { %2065 = vmatmul.mubr.msk.f32.gmra.mrb[14].mxu0 %vm325_vm0, %v297_v56 }
  0x2f   : > { %2089 = vmatmul.mubr.msk.f32.gmra.mrb[14].mxu1 %vm325_vm0, %v313_v58 }
  0x30   : > { %2274 = vmatpush3.bf16.msra.mxu1 %v2271_v61 }
  0xe5   : > { %v2045_v11 = vpop.f32.mrb[0].mxu0 }
  0xe6   : > { %v494_v12 = vadd.f32 %v2045_v11, %v2648_v10  ;;  %v488_v13 = vpop.f32.mrb[1].mxu0  ;;  %v2652_v15 = vpop.f32.mrb[0].mxu1 }
  0xe7   : > { %v489_v14 = vadd.f32 %v2648_v10, %v488_v13  ;;  %v568_v18 = vpop.f32.mrb[1].mxu1  ;;  %v574_v9 = vadd.f32 %v2652_v15, %v2648_v10 }
  0xe8   : > { %v648_v19 = vmax.f32 %v494_v12, 0.0  ;;  %v569_v3 = vadd.f32 %v2648_v10, %v568_v18 }
  0xe9   : > { %v647_v16 = vmax.f32 %v489_v14, 0.0  ;;  %v2048_v17 = vpop.f32.mrb[2].mxu0 }
  0xea   : > { %v504_v20 = vadd.f32 %v2048_v17, %v2648_v10  ;;  %v498_v21 = vpop.f32.mrb[3].mxu0  ;;  %v2656_v23 = vpop.f32.mrb[2].mxu1  ;;  %v663_v13 = vmax.f32 %v569_v3, 0.0  ;;  %v664_v17 = vmax.f32 %v574_v9, 0.0 }
  0xeb   : > { %v499_v22 = vadd.f32 %v2648_v10, %v498_v21  ;;  %2123 = vmatprep.mubr.f32.mxu1 %v647_v16  ;;  %v2658_v26 = vpop.f32.mrb[3].mxu1  ;;  %v584_v18 = vadd.f32 %v2656_v23, %v2648_v10 }
  0xec   : > { %2124 = vmatmul.mubr.f32.vlgmr.msra.gmra.mrb[16].mxu1 %v648_v19  ;;  %v650_v27 = vmax.f32 %v504_v20, 0.0  ;;  %v579_v14 = vadd.f32 %v2648_v10, %v2658_v26 }
  0xed   : > { %v649_v24 = vmax.f32 %v499_v22, 0.0  ;;  %v2051_v25 = vpop.f32.mrb[4].mxu0  ;;  %v666_v21 = vmax.f32 %v584_v18, 0.0 }
  0xee   : > { %v514_v28 = vadd.f32 %v2051_v25, %v2648_v10  ;;  %v508_v29 = vpop.f32.mrb[5].mxu0  ;;  %v2662_v32 = vpop.f32.mrb[4].mxu1  ;;  %v665_v19 = vmax.f32 %v579_v14, 0.0 }
  0xef   : > { %v509_v30 = vadd.f32 %v2648_v10, %v508_v29  ;;  %2126 = vmatprep.mubr.f32.mxu1 %v649_v24  ;;  %v588_v35 = vpop.f32.mrb[5].mxu1  ;;  %v594_v15 = vadd.f32 %v2662_v32, %v2648_v10 }
  0xf0   : > { %v652_v31 = vmax.f32 %v514_v28, 0.0  ;;  %2127 = vmatmul.mubr.f32.gmra.mrb[18].mxu1 %v650_v27  ;;  %v589_v20 = vadd.f32 %v2648_v10, %v588_v35 }
  0xf1   : > { %v651_v33 = vmax.f32 %v509_v30, 0.0  ;;  %v2054_v34 = vpop.f32.mrb[6].mxu0  ;;  %v668_v25 = vmax.f32 %v594_v15, 0.0 }
  0xf2   : > { %v524_v36 = vadd.f32 %v2054_v34, %v2648_v10  ;;  %v518_v37 = vpop.f32.mrb[7].mxu0  ;;  %v2078_v40 = vpop.f32.mrb[6].mxu1  ;;  %v667_v22 = vmax.f32 %v589_v20, 0.0 }
  0xf3   : > { %v519_v38 = vadd.f32 %v2648_v10, %v518_v37  ;;  %2129 = vmatprep.mubr.f32.mxu1 %v651_v33  ;;  %v598_v43 = vpop.f32.mrb[7].mxu1  ;;  %v604_v26 = vadd.f32 %v2078_v40, %v2648_v10 }
  0xf4   : > { %v654_v39 = vmax.f32 %v524_v36, 0.0  ;;  %2130 = vmatmul.mubr.f32.gmra.mrb[20].mxu1 %v652_v31  ;;  %v599_v24 = vadd.f32 %v2648_v10, %v598_v43 }
  0xf5   : > { %v653_v41 = vmax.f32 %v519_v38, 0.0  ;;  %v2057_v42 = vpop.f32.mrb[8].mxu0  ;;  %v670_v28 = vmax.f32 %v604_v26, 0.0 }
  0xf6   : > { %v534_v44 = vadd.f32 %v2057_v42, %v2648_v10  ;;  %v528_v45 = vpop.f32.mrb[9].mxu0  ;;  %v2081_v48 = vpop.f32.mrb[8].mxu1  ;;  %v669_v27 = vmax.f32 %v599_v24, 0.0 }
  0xf7   : > { %v529_v46 = vadd.f32 %v2648_v10, %v528_v45  ;;  %2132 = vmatprep.mubr.f32.mxu1 %v653_v41  ;;  %v608_v51 = vpop.f32.mrb[9].mxu1  ;;  %v614_v29 = vadd.f32 %v2081_v48, %v2648_v10 }
  0xf8   : > { %v656_v47 = vmax.f32 %v534_v44, 0.0  ;;  %2133 = vmatmul.mubr.f32.gmra.mrb[22].mxu1 %v654_v39  ;;  %v609_v23 = vadd.f32 %v2648_v10, %v608_v51  ;;  %v2697_v44 = vld [vmem:[%s3198_s4] ss:$0 sm:$0xff] }
  0xf9   : > { %v655_v49 = vmax.f32 %v529_v46, 0.0  ;;  %v2060_v50 = vpop.f32.mrb[10].mxu0  ;;  %v672_v32 = vmax.f32 %v614_v29, 0.0 }
  0xfa   : > { %v544_v52 = vadd.f32 %v2060_v50, %v2648_v10  ;;  %v538_v53 = vpop.f32.mrb[11].mxu0  ;;  %v2084_v56 = vpop.f32.mrb[10].mxu1  ;;  %v671_v30 = vmax.f32 %v609_v23, 0.0 }
  0xfb   : > { %v539_v54 = vadd.f32 %v2648_v10, %v538_v53  ;;  %2135 = vmatprep.mubr.f32.mxu1 %v655_v49  ;;  %v618_v59 = vpop.f32.mrb[11].mxu1  ;;  %v624_v33 = vadd.f32 %v2084_v56, %v2648_v10 }
  0xfc   : > { %v658_v55 = vmax.f32 %v544_v52, 0.0  ;;  %2136 = vmatmul.mubr.f32.gmra.mrb[24].mxu1 %v656_v47  ;;  %v619_v31 = vadd.f32 %v2648_v10, %v618_v59 }
  0xfd   : > { %v657_v57 = vmax.f32 %v539_v54, 0.0  ;;  %v2063_v58 = vpop.f32.mrb[12].mxu0  ;;  %v674_v36 = vmax.f32 %v624_v33, 0.0 }
  0xfe   : > { %v554_v60 = vadd.f32 %v2063_v58, %v2648_v10  ;;  %v548_v61 = vpop.f32.mrb[13].mxu0  ;;  %v2087_v0 = vpop.f32.mrb[12].mxu1  ;;  %v673_v34 = vmax.f32 %v619_v31, 0.0 }
  0xff   : > { %v549_v62 = vadd.f32 %v2648_v10, %v548_v61  ;;  %2138 = vmatprep.mubr.f32.mxu1 %v657_v57  ;;  %v628_v4 = vpop.f32.mrb[13].mxu1  ;;  %v634_v37 = vadd.f32 %v2087_v0, %v2648_v10 }
 0x100   : > { %v660_v63 = vmax.f32 %v554_v60, 0.0  ;;  %2139 = vmatmul.mubr.f32.gmra.mrb[26].mxu1 %v658_v55  ;;  %v629_v35 = vadd.f32 %v2648_v10, %v628_v4 }
 0x101   : > { %v659_v1 = vmax.f32 %v549_v62, 0.0  ;;  %v2066_v2 = vpop.f32.mrb[14].mxu0  ;;  %v676_v40 = vmax.f32 %v634_v37, 0.0 }
 0x102   : > { %v564_v5 = vadd.f32 %v2066_v2, %v2648_v10  ;;  %v558_v6 = vpop.f32.mrb[15].mxu0  ;;  %v2090_v11 = vpop.f32.mrb[14].mxu1  ;;  %v675_v38 = vmax.f32 %v629_v35, 0.0 }
 0x103   : > { %v559_v7 = vadd.f32 %v2648_v10, %v558_v6  ;;  %2141 = vmatprep.mubr.f32.mxu1 %v659_v1  ;;  %v638_v16 = vpop.f32.mrb[15].mxu1  ;;  %v644_v41 = vadd.f32 %v2090_v11, %v2648_v10 }
 0x104   : > { %v662_v8 = vmax.f32 %v564_v5, 0.0  ;;  %2142 = vmatmul.mubr.f32.gmra.mrb[28].mxu1 %v660_v63  ;;  %v639_v39 = vadd.f32 %v2648_v10, %v638_v16 }
 0x105   : > { %v661_v12 = vmax.f32 %v559_v7, 0.0  ;;  %v678_v43 = vmax.f32 %v644_v41, 0.0 }
 0x106   : > { %v677_v42 = vmax.f32 %v639_v39, 0.0 }
 0x107   : > { %2144 = vmatprep.mubr.f32.mxu1 %v661_v12 }
 0x108   : > { %2145 = vmatmul.mubr.f32.gmra.mrb[30].mxu1 %v662_v8 }
 0x109   : > { %2147 = vmatprep.mubr.f32.mxu1 %v663_v13 }
 0x10c   : > { %2148 = vmatmul.mubr.f32.gmra.mrb[32].mxu1 %v664_v17 }
 0x10d   : > { %2150 = vmatprep.mubr.f32.mxu1 %v665_v19 }
 0x110   : > { %2151 = vmatmul.mubr.f32.gmra.mrb[34].mxu1 %v666_v21 }
 0x111   : > { %2153 = vmatprep.mubr.f32.mxu1 %v667_v22 }
 0x114   : > { %2154 = vmatmul.mubr.f32.gmra.mrb[36].mxu1 %v668_v25 }
 0x115   : > { %2156 = vmatprep.mubr.f32.mxu1 %v669_v27 }
 0x118   : > { %2157 = vmatmul.mubr.f32.gmra.mrb[38].mxu1 %v670_v28 }
 0x119   : > { %2159 = vmatprep.mubr.f32.mxu1 %v671_v30 }
 0x11c   : > { %2160 = vmatmul.mubr.f32.gmra.mrb[40].mxu1 %v672_v32 }
 0x11d   : > { %2162 = vmatprep.mubr.f32.mxu1 %v673_v34 }
 0x120   : > { %2163 = vmatmul.mubr.f32.gmra.mrb[42].mxu1 %v674_v36 }
 0x121   : > { %2165 = vmatprep.mubr.f32.mxu1 %v675_v38 }
 0x124   : > { %2166 = vmatmul.mubr.f32.gmra.mrb[44].mxu1 %v676_v40 }
 0x125   : > { %2168 = vmatprep.mubr.f32.mxu1 %v677_v42 }
 0x128   : > { %2169 = vmatmul.mubr.f32.gmra.mrb[46].mxu1 %v678_v43 }
 0x1bf   : > { %v2125_v45 = vpop.f32.mrb[16].mxu1 }
 0x1c0   : > { %v774_v46 = vadd.f32 %v2125_v45, %v2697_v44  ;;  %v768_v47 = vpop.f32.mrb[17].mxu1 }
 0x1c1   : > { %v769_v48 = vadd.f32 %v2697_v44, %v768_v47 }
 0x1c2   : > { %v928_v50 = vmax.f32 %v774_v46, 0.0 }
 0x1c3   : > { %v927_v49 = vmax.f32 %v769_v48, 0.0  ;;  %v2128_v10 = vpop.f32.mrb[18].mxu1 }
 0x1c4   : > { %v784_v51 = vadd.f32 %v2128_v10, %v2697_v44  ;;  %v778_v52 = vpop.f32.mrb[19].mxu1 }
 0x1c5   : > { %v779_v53 = vadd.f32 %v2697_v44, %v778_v52  ;;  %2187 = vmatprep.mubr.msk.f32.mxu0 %vm974_vm1, %v927_v49 }
 0x1c6   : > { %2188 = vmatmul.mubr.msk.f32.vlgmr.msra.gmra.mrb[16].mxu0 %vm974_vm1, %v928_v50  ;;  %v930_v56 = vmax.f32 %v784_v51, 0.0 }
 0x1c7   : > { %v929_v54 = vmax.f32 %v779_v53, 0.0  ;;  %v2131_v55 = vpop.f32.mrb[20].mxu1 }
 0x1c8   : > { %v794_v57 = vadd.f32 %v2131_v55, %v2697_v44  ;;  %v788_v58 = vpop.f32.mrb[21].mxu1 }
 0x1c9   : > { %v789_v59 = vadd.f32 %v2697_v44, %v788_v58  ;;  %2190 = vmatprep.mubr.msk.f32.mxu0 %vm974_vm1, %v929_v54 }
 0x1ca   : > { %v932_v60 = vmax.f32 %v794_v57, 0.0  ;;  %2191 = vmatmul.mubr.msk.f32.gmra.mrb[18].mxu0 %vm974_vm1, %v930_v56 }
 0x1cb   : > { %v931_v61 = vmax.f32 %v789_v59, 0.0  ;;  %v2134_v62 = vpop.f32.mrb[22].mxu1 }
 0x1cc   : > { %v804_v63 = vadd.f32 %v2134_v62, %v2697_v44  ;;  %v798_v0 = vpop.f32.mrb[23].mxu1 }
 0x1cd   : > { %v799_v1 = vadd.f32 %v2697_v44, %v798_v0  ;;  %2193 = vmatprep.mubr.msk.f32.mxu0 %vm974_vm1, %v931_v61 }
 0x1ce   : > { %v934_v2 = vmax.f32 %v804_v63, 0.0  ;;  %2194 = vmatmul.mubr.msk.f32.gmra.mrb[20].mxu0 %vm974_vm1, %v932_v60 }
 0x1cf   : > { %v933_v3 = vmax.f32 %v799_v1, 0.0  ;;  %v2137_v4 = vpop.f32.mrb[24].mxu1 }
 0x1d0   : > { %v814_v5 = vadd.f32 %v2137_v4, %v2697_v44  ;;  %v808_v6 = vpop.f32.mrb[25].mxu1 }
 0x1d1   : > { %v809_v7 = vadd.f32 %v2697_v44, %v808_v6  ;;  %2196 = vmatprep.mubr.msk.f32.mxu0 %vm974_vm1, %v933_v3 }
 0x1d2   : > { %v936_v8 = vmax.f32 %v814_v5, 0.0  ;;  %2197 = vmatmul.mubr.msk.f32.gmra.mrb[22].mxu0 %vm974_vm1, %v934_v2 }
 0x1d3   : > { %v935_v9 = vmax.f32 %v809_v7, 0.0  ;;  %v2140_v11 = vpop.f32.mrb[26].mxu1 }
 0x1d4   : > { %v824_v12 = vadd.f32 %v2140_v11, %v2697_v44  ;;  %v818_v13 = vpop.f32.mrb[27].mxu1 }
 0x1d5   : > { %v819_v14 = vadd.f32 %v2697_v44, %v818_v13  ;;  %2199 = vmatprep.mubr.msk.f32.mxu0 %vm974_vm1, %v935_v9 }
 0x1d6   : > { %v938_v16 = vmax.f32 %v824_v12, 0.0  ;;  %2200 = vmatmul.mubr.msk.f32.gmra.mrb[24].mxu0 %vm974_vm1, %v936_v8 }
 0x1d7   : > { %v937_v17 = vmax.f32 %v819_v14, 0.0  ;;  %v2143_v18 = vpop.f32.mrb[28].mxu1  ;;  %v2766_v14 = vld [vmem:[%s3200_s6] ss:$0 sm:$0xff] }
 0x1d8   : > { %v834_v19 = vadd.f32 %v2143_v18, %v2697_v44  ;;  %v828_v20 = vpop.f32.mrb[29].mxu1 }
 0x1d9   : > { %v829_v21 = vadd.f32 %v2697_v44, %v828_v20  ;;  %2202 = vmatprep.mubr.msk.f32.mxu0 %vm974_vm1, %v937_v17 }
 0x1da   : > { %v940_v15 = vmax.f32 %v834_v19, 0.0  ;;  %2203 = vmatmul.mubr.msk.f32.gmra.mrb[26].mxu0 %vm974_vm1, %v938_v16 }
 0x1db   : > { %v939_v22 = vmax.f32 %v829_v21, 0.0  ;;  %v2146_v24 = vpop.f32.mrb[30].mxu1 }
 0x1dc   : > { %v844_v25 = vadd.f32 %v2146_v24, %v2697_v44  ;;  %v838_v26 = vpop.f32.mrb[31].mxu1 }
 0x1dd   : > { %v839_v27 = vadd.f32 %v2697_v44, %v838_v26  ;;  %2205 = vmatprep.mubr.msk.f32.mxu0 %vm974_vm1, %v939_v22 }
 0x1de   : > { %v942_v23 = vmax.f32 %v844_v25, 0.0  ;;  %2206 = vmatmul.mubr.msk.f32.gmra.mrb[28].mxu0 %vm974_vm1, %v940_v15 }
 0x1df   : > { %v941_v28 = vmax.f32 %v839_v27, 0.0  ;;  %v2149_v29 = vpop.f32.mrb[32].mxu1 }
 0x1e0   : > { %v854_v30 = vadd.f32 %v2149_v29, %v2697_v44  ;;  %v848_v31 = vpop.f32.mrb[33].mxu1 }
 0x1e1   : > { %v849_v32 = vadd.f32 %v2697_v44, %v848_v31  ;;  %2208 = vmatprep.mubr.msk.f32.mxu0 %vm974_vm1, %v941_v28 }
 0x1e2   : > { %v944_v33 = vmax.f32 %v854_v30, 0.0  ;;  %2209 = vmatmul.mubr.msk.f32.gmra.mrb[30].mxu0 %vm974_vm1, %v942_v23 }
 0x1e3   : > { %v943_v34 = vmax.f32 %v849_v32, 0.0  ;;  %v2152_v35 = vpop.f32.mrb[34].mxu1 }
 0x1e4   : > { %v864_v36 = vadd.f32 %v2152_v35, %v2697_v44  ;;  %v858_v37 = vpop.f32.mrb[35].mxu1 }
 0x1e5   : > { %v859_v38 = vadd.f32 %v2697_v44, %v858_v37  ;;  %2211 = vmatprep.mubr.msk.f32.mxu0 %vm974_vm1, %v943_v34 }
 0x1e6   : > { %v946_v39 = vmax.f32 %v864_v36, 0.0  ;;  %2212 = vmatmul.mubr.msk.f32.gmra.mrb[32].mxu0 %vm974_vm1, %v944_v33 }
 0x1e7   : > { %v945_v40 = vmax.f32 %v859_v38, 0.0  ;;  %v2155_v41 = vpop.f32.mrb[36].mxu1 }
 0x1e8   : > { %v874_v42 = vadd.f32 %v2155_v41, %v2697_v44  ;;  %v868_v43 = vpop.f32.mrb[37].mxu1 }
 0x1e9   : > { %v869_v45 = vadd.f32 %v2697_v44, %v868_v43  ;;  %2214 = vmatprep.mubr.msk.f32.mxu0 %vm974_vm1, %v945_v40 }
 0x1ea   : > { %v948_v46 = vmax.f32 %v874_v42, 0.0  ;;  %2215 = vmatmul.mubr.msk.f32.gmra.mrb[34].mxu0 %vm974_vm1, %v946_v39 }
 0x1eb   : > { %v947_v47 = vmax.f32 %v869_v45, 0.0  ;;  %v2158_v48 = vpop.f32.mrb[38].mxu1 }
 0x1ec   : > { %v884_v49 = vadd.f32 %v2158_v48, %v2697_v44  ;;  %v878_v10 = vpop.f32.mrb[39].mxu1 }
 0x1ed   : > { %v879_v50 = vadd.f32 %v2697_v44, %v878_v10  ;;  %2217 = vmatprep.mubr.msk.f32.mxu0 %vm974_vm1, %v947_v47 }
 0x1ee   : > { %v950_v51 = vmax.f32 %v884_v49, 0.0  ;;  %2218 = vmatmul.mubr.msk.f32.gmra.mrb[36].mxu0 %vm974_vm1, %v948_v46 }
 0x1ef   : > { %v949_v52 = vmax.f32 %v879_v50, 0.0  ;;  %v2161_v53 = vpop.f32.mrb[40].mxu1 }
 0x1f0   : > { %v894_v54 = vadd.f32 %v2161_v53, %v2697_v44  ;;  %v888_v55 = vpop.f32.mrb[41].mxu1 }
 0x1f1   : > { %v889_v56 = vadd.f32 %v2697_v44, %v888_v55  ;;  %2220 = vmatprep.mubr.msk.f32.mxu0 %vm974_vm1, %v949_v52 }
 0x1f2   : > { %v952_v57 = vmax.f32 %v894_v54, 0.0  ;;  %2221 = vmatmul.mubr.msk.f32.gmra.mrb[38].mxu0 %vm974_vm1, %v950_v51 }
 0x1f3   : > { %v951_v58 = vmax.f32 %v889_v56, 0.0  ;;  %v2164_v59 = vpop.f32.mrb[42].mxu1 }
 0x1f4   : > { %v904_v60 = vadd.f32 %v2164_v59, %v2697_v44  ;;  %v898_v61 = vpop.f32.mrb[43].mxu1 }
 0x1f5   : > { %v899_v62 = vadd.f32 %v2697_v44, %v898_v61  ;;  %2223 = vmatprep.mubr.msk.f32.mxu0 %vm974_vm1, %v951_v58 }
 0x1f6   : > { %v954_v63 = vmax.f32 %v904_v60, 0.0  ;;  %2224 = vmatmul.mubr.msk.f32.gmra.mrb[40].mxu0 %vm974_vm1, %v952_v57 }
 0x1f7   : > { %v953_v0 = vmax.f32 %v899_v62, 0.0  ;;  %v2167_v1 = vpop.f32.mrb[44].mxu1 }
 0x1f8   : > { %v914_v2 = vadd.f32 %v2167_v1, %v2697_v44  ;;  %v908_v3 = vpop.f32.mrb[45].mxu1 }
 0x1f9   : > { %v909_v4 = vadd.f32 %v2697_v44, %v908_v3  ;;  %2226 = vmatprep.mubr.msk.f32.mxu0 %vm974_vm1, %v953_v0 }
 0x1fa   : > { %v956_v5 = vmax.f32 %v914_v2, 0.0  ;;  %2227 = vmatmul.mubr.msk.f32.gmra.mrb[42].mxu0 %vm974_vm1, %v954_v63 }
 0x1fb   : > { %v955_v6 = vmax.f32 %v909_v4, 0.0  ;;  %v2170_v7 = vpop.f32.mrb[46].mxu1 }
 0x1fc   : > { %v924_v8 = vadd.f32 %v2170_v7, %v2697_v44  ;;  %v918_v9 = vpop.f32.mrb[47].mxu1 }
 0x1fd   : > { %v919_v11 = vadd.f32 %v2697_v44, %v918_v9  ;;  %2229 = vmatprep.mubr.msk.f32.mxu0 %vm974_vm1, %v955_v6 }
 0x1fe   : > { %v958_v12 = vmax.f32 %v924_v8, 0.0  ;;  %2230 = vmatmul.mubr.msk.f32.gmra.mrb[44].mxu0 %vm974_vm1, %v956_v5 }
 0x1ff   : > { %v957_v13 = vmax.f32 %v919_v11, 0.0 }
 0x201   : > { %2232 = vmatprep.mubr.msk.f32.mxu0 %vm974_vm1, %v957_v13 }
 0x202   : > { %2233 = vmatmul.mubr.msk.f32.gmra.mrb[46].mxu0 %vm974_vm1, %v958_v12 }
 0x299   : > { %v2189_v16 = vpop.f32.mrb[16].mxu0 }
 0x29a   : > { %v2769_v17 = vadd.f32 %v2189_v16, %v2766_v14  ;;  %v1137_v44 = vpop.f32.mrb[17].mxu0 }
 0x29b   : > { %v2772_v18 = vadd.f32 %v2766_v14, %v1137_v44 }
 0x29c   : > { %v1300_v19 = vsel %vm1296_vm2, %v2769_v17, -inf }
 0x29d   : > { %1301 = vmax.xlane.f32.xlu0 %v1300_v19  ;;  %v2192_v20 = vpop.f32.mrb[18].mxu0  ;;  %v1297_v25 = vsel %vm1296_vm2, %v2772_v18, -inf }
 0x29e   : > { %v2777_v21 = vadd.f32 %v2192_v20, %v2766_v14  ;;  %v1147_v15 = vpop.f32.mrb[19].mxu0 }
 0x29f   : > { %v2780_v22 = vadd.f32 %v2766_v14, %v1147_v15 }
 0x2a0   : > { %v1306_v24 = vsel %vm1296_vm2, %v2777_v21, -inf }
 0x2a1   : > { %1307 = vmax.xlane.f32.xlu1 %v1306_v24  ;;  %v2195_v26 = vpop.f32.mrb[20].mxu0  ;;  %1298 = vmax.xlane.f32.xlu0 %v1297_v25  ;;  %v1303_v29 = vsel %vm1296_vm2, %v2780_v22, -inf }
 0x2a2   : > { %v1157_v27 = vpop.f32.mrb[21].mxu0  ;;  %v2790_v28 = vadd.f32 %v2195_v26, %v2766_v14 }
 0x2a3   : > { %v2787_v23 = vadd.f32 %v2766_v14, %v1157_v27 }
 0x2a4   : > { %v1312_v35 = vsel %vm1296_vm2, %v2790_v28, -inf }
 0x2a5   : > { %v2198_v30 = vpop.f32.mrb[22].mxu0  ;;  %1304 = vmax.xlane.f32.xlu1 %v1303_v29  ;;  %v1309_v31 = vsel %vm1296_vm2, %v2787_v23, -inf }
 0x2a6   : > { %v1167_v32 = vpop.f32.mrb[23].mxu0  ;;  %1310 = vmax.xlane.f32.xlu0 %v1309_v31  ;;  %v2800_v34 = vadd.f32 %v2198_v30, %v2766_v14 }
 0x2a7   : > { %v2797_v33 = vadd.f32 %v2766_v14, %v1167_v32 }
 0x2a8   : > { %v1318_v41 = vsel %vm1296_vm2, %v2800_v34, -inf }
 0x2a9   : > { %v2201_v36 = vpop.f32.mrb[24].mxu0  ;;  %1313 = vmax.xlane.f32.xlu1 %v1312_v35  ;;  %v1315_v37 = vsel %vm1296_vm2, %v2797_v33, -inf }
 0x2aa   : > { %v1177_v38 = vpop.f32.mrb[25].mxu0  ;;  %1316 = vmax.xlane.f32.xlu0 %v1315_v37  ;;  %v2810_v40 = vadd.f32 %v2201_v36, %v2766_v14 }
 0x2ab   : > { %v2807_v39 = vadd.f32 %v2766_v14, %v1177_v38 }
 0x2ac   : > { %v1324_v48 = vsel %vm1296_vm2, %v2810_v40, -inf }
 0x2ad   : > { %v2204_v42 = vpop.f32.mrb[26].mxu0  ;;  %1319 = vmax.xlane.f32.xlu1 %v1318_v41  ;;  %v1321_v43 = vsel %vm1296_vm2, %v2807_v39, -inf }
 0x2ae   : > { %v1187_v45 = vpop.f32.mrb[27].mxu0  ;;  %1322 = vmax.xlane.f32.xlu0 %v1321_v43  ;;  %v2820_v47 = vadd.f32 %v2204_v42, %v2766_v14 }
 0x2af   : > { %v2817_v46 = vadd.f32 %v2766_v14, %v1187_v45 }
 0x2b0   : > { %v1330_v53 = vsel %vm1296_vm2, %v2820_v47, -inf }
 0x2b1   : > { %v2207_v49 = vpop.f32.mrb[28].mxu0  ;;  %1325 = vmax.xlane.f32.xlu1 %v1324_v48  ;;  %v1327_v10 = vsel %vm1296_vm2, %v2817_v46, -inf }
 0x2b2   : > { %v1197_v50 = vpop.f32.mrb[29].mxu0  ;;  %1328 = vmax.xlane.f32.xlu0 %v1327_v10  ;;  %v2830_v52 = vadd.f32 %v2207_v49, %v2766_v14 }
 0x2b3   : > { %v2827_v51 = vadd.f32 %v2766_v14, %v1197_v50 }
 0x2b4   : > { %v1336_v59 = vsel %vm1296_vm2, %v2830_v52, -inf }
 0x2b5   : > { %v2210_v54 = vpop.f32.mrb[30].mxu0  ;;  %1331 = vmax.xlane.f32.xlu1 %v1330_v53  ;;  %v1333_v55 = vsel %vm1296_vm2, %v2827_v51, -inf }
 0x2b6   : > { %v1207_v56 = vpop.f32.mrb[31].mxu0  ;;  %1334 = vmax.xlane.f32.xlu0 %v1333_v55  ;;  %v2840_v58 = vadd.f32 %v2210_v54, %v2766_v14 }
 0x2b7   : > { %v2837_v57 = vadd.f32 %v2766_v14, %v1207_v56 }
 0x2b8   : > { %v1342_v1 = vsel %vm1296_vm2, %v2840_v58, -inf }
 0x2b9   : > { %v2213_v60 = vpop.f32.mrb[32].mxu0  ;;  %1337 = vmax.xlane.f32.xlu1 %v1336_v59  ;;  %v1339_v61 = vsel %vm1296_vm2, %v2837_v57, -inf }
 0x2ba   : > { %v1217_v62 = vpop.f32.mrb[33].mxu0  ;;  %1340 = vmax.xlane.f32.xlu0 %v1339_v61  ;;  %v2850_v0 = vadd.f32 %v2213_v60, %v2766_v14 }
 0x2bb   : > { %v2847_v63 = vadd.f32 %v2766_v14, %v1217_v62 }
 0x2bc   : > { %v1348_v7 = vsel %vm1296_vm2, %v2850_v0, -inf }
 0x2bd   : > { %v2216_v2 = vpop.f32.mrb[34].mxu0  ;;  %1343 = vmax.xlane.f32.xlu1 %v1342_v1  ;;  %v1345_v3 = vsel %vm1296_vm2, %v2847_v63, -inf }
 0x2be   : > { %v1227_v4 = vpop.f32.mrb[35].mxu0  ;;  %1346 = vmax.xlane.f32.xlu0 %v1345_v3  ;;  %v2860_v6 = vadd.f32 %v2216_v2, %v2766_v14 }
 0x2bf   : > { %v2857_v5 = vadd.f32 %v2766_v14, %v1227_v4 }
 0x2c0   : > { %v1354_v16 = vsel %vm1296_vm2, %v2860_v6, -inf }
 0x2c1   : > { %v2219_v8 = vpop.f32.mrb[36].mxu0  ;;  %1349 = vmax.xlane.f32.xlu1 %v1348_v7  ;;  %v1351_v9 = vsel %vm1296_vm2, %v2857_v5, -inf }
 0x2c2   : > { %v1237_v11 = vpop.f32.mrb[37].mxu0  ;;  %1352 = vmax.xlane.f32.xlu0 %v1351_v9  ;;  %v2870_v13 = vadd.f32 %v2219_v8, %v2766_v14 }
 0x2c3   : > { %v2867_v12 = vadd.f32 %v2766_v14, %v1237_v11 }
 0x2c4   : > { %v1360_v25 = vsel %vm1296_vm2, %v2870_v13, -inf }
 0x2c5   : > { %v2222_v44 = vpop.f32.mrb[38].mxu0  ;;  %1355 = vmax.xlane.f32.xlu1 %v1354_v16  ;;  %v1357_v19 = vsel %vm1296_vm2, %v2867_v12, -inf }
 0x2c6   : > { %v1247_v20 = vpop.f32.mrb[39].mxu0  ;;  %1358 = vmax.xlane.f32.xlu0 %v1357_v19  ;;  %v2880_v24 = vadd.f32 %v2222_v44, %v2766_v14 }
 0x2c7   : > { %v2877_v15 = vadd.f32 %v2766_v14, %v1247_v20 }
 0x2c8   : > { %v1366_v32 = vsel %vm1296_vm2, %v2880_v24, -inf }
 0x2c9   : > { %v2225_v26 = vpop.f32.mrb[40].mxu0  ;;  %1361 = vmax.xlane.f32.xlu1 %v1360_v25  ;;  %v1363_v27 = vsel %vm1296_vm2, %v2877_v15, -inf }
 0x2ca   : > { %v1257_v29 = vpop.f32.mrb[41].mxu0  ;;  %1364 = vmax.xlane.f32.xlu0 %v1363_v27  ;;  %v2890_v31 = vadd.f32 %v2225_v26, %v2766_v14 }
 0x2cb   : > { %v2887_v30 = vadd.f32 %v2766_v14, %v1257_v29 }
 0x2cc   : > { %v1372_v42 = vsel %vm1296_vm2, %v2890_v31, -inf }
 0x2cd   : > { %v2228_v35 = vpop.f32.mrb[42].mxu0  ;;  %1367 = vmax.xlane.f32.xlu1 %v1366_v32  ;;  %v1369_v36 = vsel %vm1296_vm2, %v2887_v30, -inf }
 0x2ce   : > { %v1267_v37 = vpop.f32.mrb[43].mxu0  ;;  %1370 = vmax.xlane.f32.xlu0 %v1369_v36  ;;  %v2900_v41 = vadd.f32 %v2228_v35, %v2766_v14 }
 0x2cf   : > { %v2897_v38 = vadd.f32 %v2766_v14, %v1267_v37 }
 0x2d0   : > { %v1378_v50 = vsel %vm1296_vm2, %v2900_v41, -inf }
 0x2d1   : > { %v2231_v43 = vpop.f32.mrb[44].mxu0  ;;  %1373 = vmax.xlane.f32.xlu1 %v1372_v42  ;;  %v1375_v45 = vsel %vm1296_vm2, %v2897_v38, -inf }
 0x2d2   : > { %v1277_v48 = vpop.f32.mrb[45].mxu0  ;;  %1376 = vmax.xlane.f32.xlu0 %v1375_v45  ;;  %v2910_v10 = vadd.f32 %v2231_v43, %v2766_v14 }
 0x2d3   : > { %v2907_v49 = vadd.f32 %v2766_v14, %v1277_v48 }
 0x2d4   : > { %v1384_v60 = vsel %vm1296_vm2, %v2910_v10, -inf }
 0x2d5   : > { %v2234_v53 = vpop.f32.mrb[46].mxu0  ;;  %1379 = vmax.xlane.f32.xlu1 %v1378_v50  ;;  %v1381_v54 = vsel %vm1296_vm2, %v2907_v49, -inf }
 0x2d6   : > { %v2917_v55 = vadd.f32 %v2234_v53, %v2766_v14  ;;  %v1287_v56 = vpop.f32.mrb[47].mxu0  ;;  %1382 = vmax.xlane.f32.xlu0 %v1381_v54 }
 0x2d7   : > { %v2920_v59 = vadd.f32 %v2766_v14, %v1287_v56 }
 0x2d8   : > { %v1390_v62 = vsel %vm1296_vm2, %v2917_v55, -inf }
 0x2d9   : > { %1385 = vmax.xlane.f32.xlu1 %v1384_v60  ;;  %v1387_v61 = vsel %vm1296_vm2, %v2920_v59, -inf }
 0x2da   : > { %1388 = vmax.xlane.f32.xlu0 %v1387_v61 }
 0x2dd   : > { %1391 = vmax.xlane.f32.xlu1 %v1390_v62 }
 0x32a   : > { %v1302_v1 = vpop.xlane.xlu0 %1301 }
 0x32b   : > { %v1394_v2 = vsub.f32 %v2769_v17, %v1302_v1 }
 0x32d   : > { %v1427_v3 = vmul.f32 1.442695, %v1394_v2 }
 0x32e   : > { %v1308_v4 = vpop.xlane.xlu1 %1307  ;;  %v1299_v7 = vpop.xlane.xlu0 %1298 }
 0x32f   : > { %2303 = vpow2.f32 %v1427_v3  ;;  %v1396_v14 = vsub.f32 %v2777_v21, %v1308_v4  ;;  %v1393_v8 = vsub.f32 %v2772_v18, %v1299_v7 }
 0x331   : > { %v1431_v9 = vmul.f32 1.442695, %v1396_v14  ;;  %v1425_v11 = vmul.f32 1.442695, %v1393_v8 }
 0x332   : > { %v1305_v16 = vpop.xlane.xlu1 %1304 }
 0x333   : > { %2305 = vpow2.f32 %v1431_v9  ;;  %v1395_v44 = vsub.f32 %v2780_v22, %v1305_v16  ;;  %v1311_v19 = vpop.xlane.xlu0 %1310 }
 0x334   : > { %2307 = vpow2.f32 %v1425_v11  ;;  %v1397_v20 = vsub.f32 %v2787_v23, %v1311_v19 }
 0x335   : > { %v1429_v25 = vmul.f32 1.442695, %v1395_v44 }
 0x336   : > { %v1433_v17 = vmul.f32 1.442695, %v1397_v20  ;;  %v1314_v26 = vpop.xlane.xlu1 %1313 }
 0x337   : > { %2309 = vpow2.f32 %v1429_v25  ;;  %v1398_v27 = vsub.f32 %v2790_v28, %v1314_v26  ;;  %v1317_v29 = vpop.xlane.xlu0 %1316 }
 0x338   : > { %v1399_v21 = vsub.f32 %v2797_v33, %v1317_v29  ;;  %2311 = vpow2.f32 %v1433_v17 }
 0x339   : > { %v2935_v18 = vpop.eup %2303  ;;  %v1435_v32 = vmul.f32 1.442695, %v1398_v27 }
 0x33a   : > { %v1437_v35 = vmul.f32 1.442695, %v1399_v21  ;;  %v1320_v36 = vpop.xlane.xlu1 %1319  ;;  %v1492_v22 = vsel %vm1296_vm2, %v2935_v18, 0.0 }
 0x33b   : > { %2313 = vpow2.f32 %v1435_v32  ;;  %v1400_v23 = vsub.f32 %v2800_v34, %v1320_v36  ;;  %1493 = vadd.xlane.f32.xlu1 %v1492_v22  ;;  %v1323_v37 = vpop.xlane.xlu0 %1322 }
 0x33c   : > { %v1401_v42 = vsub.f32 %v2807_v39, %v1323_v37  ;;  %2315 = vpow2.f32 %v1437_v35 }
 0x33d   : > { %v2941_v28 = vpop.eup %2305  ;;  %v1439_v43 = vmul.f32 1.442695, %v1400_v23 }
 0x33e   : > { %v2943_v33 = vpop.eup %2307  ;;  %v1441_v45 = vmul.f32 1.442695, %v1401_v42  ;;  %v1326_v48 = vpop.xlane.xlu1 %1325  ;;  %v1498_v50 = vsel %vm1296_vm2, %v2941_v28, 0.0 }
 0x33f   : > { %2317 = vpow2.f32 %v1439_v43  ;;  %v1402_v53 = vsub.f32 %v2810_v40, %v1326_v48  ;;  %1499 = vadd.xlane.f32.xlu1 %v1498_v50  ;;  %v1489_v34 = vsel %vm1296_vm2, %v2943_v33, 0.0  ;;  %v1329_v54 = vpop.xlane.xlu0 %1328 }
 0x340   : > { %1490 = vadd.xlane.f32.xlu0 %v1489_v34  ;;  %v1403_v39 = vsub.f32 %v2817_v46, %v1329_v54  ;;  %2319 = vpow2.f32 %v1441_v45 }
 0x341   : > { %v2951_v56 = vpop.eup %2309  ;;  %v1443_v60 = vmul.f32 1.442695, %v1402_v53 }
 0x342   : > { %v1445_v61 = vmul.f32 1.442695, %v1403_v39  ;;  %v1332_v62 = vpop.xlane.xlu1 %1331  ;;  %v1495_v1 = vsel %vm1296_vm2, %v2951_v56, 0.0  ;;  %v2956_v3 = vpop.eup %2311 }
 0x343   : > { %2321 = vpow2.f32 %v1443_v60  ;;  %v1404_v40 = vsub.f32 %v2820_v47, %v1332_v62  ;;  %v1335_v2 = vpop.xlane.xlu0 %1334  ;;  %v1501_v47 = vsel %vm1296_vm2, %v2956_v3, 0.0 }
 0x344   : > { %1496 = vadd.xlane.f32.xlu0 %v1495_v1  ;;  %v1405_v4 = vsub.f32 %v2827_v51, %v1335_v2  ;;  %2323 = vpow2.f32 %v1445_v61 }
 0x345   : > { %v2959_v7 = vpop.eup %2313  ;;  %v1447_v46 = vmul.f32 1.442695, %v1404_v40 }
 0x346   : > { %v1449_v14 = vmul.f32 1.442695, %v1405_v4  ;;  %v1338_v8 = vpop.xlane.xlu1 %1337  ;;  %v1504_v9 = vsel %vm1296_vm2, %v2959_v7, 0.0  ;;  %v2966_v44 = vpop.eup %2315 }
 0x347   : > { %2325 = vpow2.f32 %v1447_v46  ;;  %v1406_v11 = vsub.f32 %v2830_v52, %v1338_v8  ;;  %1505 = vadd.xlane.f32.xlu1 %v1504_v9  ;;  %v1341_v16 = vpop.xlane.xlu0 %1340  ;;  %v1507_v27 = vsel %vm1296_vm2, %v2966_v44, 0.0 }
 0x348   : > { %1502 = vadd.xlane.f32.xlu0 %v1501_v47  ;;  %v1407_v51 = vsub.f32 %v2837_v57, %v1341_v16  ;;  %2327 = vpow2.f32 %v1449_v14 }
 0x349   : > { %v2969_v19 = vpop.eup %2317  ;;  %v1451_v20 = vmul.f32 1.442695, %v1406_v11 }
 0x34a   : > { %v1453_v25 = vmul.f32 1.442695, %v1407_v51  ;;  %v1344_v17 = vpop.xlane.xlu1 %1343  ;;  %v1510_v26 = vsel %vm1296_vm2, %v2969_v19, 0.0  ;;  %v2976_v21 = vpop.eup %2319 }
 0x34b   : > { %2329 = vpow2.f32 %v1451_v20  ;;  %v1408_v52 = vsub.f32 %v2840_v58, %v1344_v17  ;;  %1511 = vadd.xlane.f32.xlu1 %v1510_v26  ;;  %v1347_v29 = vpop.xlane.xlu0 %1346  ;;  %v1513_v37 = vsel %vm1296_vm2, %v2976_v21, 0.0 }
 0x34c   : > { %1508 = vadd.xlane.f32.xlu0 %v1507_v27  ;;  %v1409_v57 = vsub.f32 %v2847_v63, %v1347_v29  ;;  %2331 = vpow2.f32 %v1453_v25 }
 0x34d   : > { %v2979_v32 = vpop.eup %2321  ;;  %v1455_v35 = vmul.f32 1.442695, %v1408_v52 }
 0x34e   : > { %v1457_v36 = vmul.f32 1.442695, %v1409_v57  ;;  %v1350_v22 = vpop.xlane.xlu1 %1349  ;;  %v1516_v23 = vsel %vm1296_vm2, %v2979_v32, 0.0  ;;  %v2986_v43 = vpop.eup %2323 }
 0x34f   : > { %2333 = vpow2.f32 %v1455_v35  ;;  %v1410_v58 = vsub.f32 %v2850_v0, %v1350_v22  ;;  %1517 = vadd.xlane.f32.xlu1 %v1516_v23  ;;  %v1353_v42 = vpop.xlane.xlu0 %1352  ;;  %v1519_v54 = vsel %vm1296_vm2, %v2986_v43, 0.0 }
 0x350   : > { %1514 = vadd.xlane.f32.xlu0 %v1513_v37  ;;  %v1411_v63 = vsub.f32 %v2857_v5, %v1353_v42  ;;  %2335 = vpow2.f32 %v1457_v36 }
 0x351   : > { %v2989_v45 = vpop.eup %2325  ;;  %v1459_v48 = vmul.f32 1.442695, %v1410_v58 }
 0x352   : > { %v1461_v50 = vmul.f32 1.442695, %v1411_v63  ;;  %v1356_v53 = vpop.xlane.xlu1 %1355  ;;  %v1522_v34 = vsel %vm1296_vm2, %v2989_v45, 0.0  ;;  %v2996_v60 = vpop.eup %2327 }
 0x353   : > { %2337 = vpow2.f32 %v1459_v48  ;;  %v1412_v0 = vsub.f32 %v2860_v6, %v1356_v53  ;;  %1523 = vadd.xlane.f32.xlu1 %v1522_v34  ;;  %v1359_v39 = vpop.xlane.xlu0 %1358  ;;  %v1525_v4 = vsel %vm1296_vm2, %v2996_v60, 0.0 }
 0x354   : > { %1520 = vadd.xlane.f32.xlu0 %v1519_v54  ;;  %v1413_v5 = vsub.f32 %v2867_v12, %v1359_v39  ;;  %2339 = vpow2.f32 %v1461_v50 }
 0x355   : > { %v2999_v61 = vpop.eup %2329  ;;  %v1463_v62 = vmul.f32 1.442695, %v1412_v0 }
 0x356   : > { %v1465_v1 = vmul.f32 1.442695, %v1413_v5  ;;  %v1362_v40 = vpop.xlane.xlu1 %1361  ;;  %v1528_v2 = vsel %vm1296_vm2, %v2999_v61, 0.0  ;;  %v3006_v14 = vpop.eup %2331 }
 0x357   : > { %2341 = vpow2.f32 %v1463_v62  ;;  %v1414_v6 = vsub.f32 %v2870_v13, %v1362_v40  ;;  %1529 = vadd.xlane.f32.xlu1 %v1528_v2  ;;  %v1365_v46 = vpop.xlane.xlu0 %1364  ;;  %v1531_v51 = vsel %vm1296_vm2, %v3006_v14, 0.0 }
 0x358   : > { %1526 = vadd.xlane.f32.xlu0 %v1525_v4  ;;  %v1415_v12 = vsub.f32 %v2877_v15, %v1365_v46  ;;  %2343 = vpow2.f32 %v1465_v1 }
 0x359   : > { %v3009_v8 = vpop.eup %2333  ;;  %v1467_v9 = vmul.f32 1.442695, %v1414_v6 }
 0x35a   : > { %v1469_v11 = vmul.f32 1.442695, %v1415_v12  ;;  %v1368_v47 = vpop.xlane.xlu1 %1367  ;;  %v1534_v16 = vsel %vm1296_vm2, %v3009_v8, 0.0  ;;  %v3016_v25 = vpop.eup %2335 }
 0x35b   : > { %2345 = vpow2.f32 %v1467_v9  ;;  %v1416_v13 = vsub.f32 %v2880_v24, %v1368_v47  ;;  %1535 = vadd.xlane.f32.xlu1 %v1534_v16  ;;  %v1371_v20 = vpop.xlane.xlu0 %1370  ;;  %v1537_v57 = vsel %vm1296_vm2, %v3016_v25, 0.0 }
 0x35c   : > { %1532 = vadd.xlane.f32.xlu0 %v1531_v51  ;;  %v1417_v15 = vsub.f32 %v2887_v30, %v1371_v20  ;;  %2347 = vpow2.f32 %v1469_v11 }
 0x35d   : > { %v3019_v17 = vpop.eup %2337  ;;  %v1471_v26 = vmul.f32 1.442695, %v1416_v13 }
 0x35e   : > { %v1473_v52 = vmul.f32 1.442695, %v1417_v15  ;;  %v1374_v27 = vpop.xlane.xlu1 %1373  ;;  %v1540_v29 = vsel %vm1296_vm2, %v3019_v17, 0.0  ;;  %v3026_v36 = vpop.eup %2339 }
 0x35f   : > { %2349 = vpow2.f32 %v1471_v26  ;;  %v1418_v24 = vsub.f32 %v2890_v31, %v1374_v27  ;;  %1541 = vadd.xlane.f32.xlu1 %v1540_v29  ;;  %v1377_v35 = vpop.xlane.xlu0 %1376  ;;  %v1543_v63 = vsel %vm1296_vm2, %v3026_v36, 0.0 }
 0x360   : > { %1538 = vadd.xlane.f32.xlu0 %v1537_v57  ;;  %v1419_v30 = vsub.f32 %v2897_v38, %v1377_v35  ;;  %2351 = vpow2.f32 %v1473_v52 }
 0x361   : > { %v3029_v22 = vpop.eup %2341  ;;  %v1475_v23 = vmul.f32 1.442695, %v1418_v24 }
 0x362   : > { %v1477_v58 = vmul.f32 1.442695, %v1419_v30  ;;  %v1380_v37 = vpop.xlane.xlu1 %1379  ;;  %v1546_v42 = vsel %vm1296_vm2, %v3029_v22, 0.0  ;;  %v3036_v50 = vpop.eup %2343 }
 0x363   : > { %2353 = vpow2.f32 %v1475_v23  ;;  %v1420_v31 = vsub.f32 %v2900_v41, %v1380_v37  ;;  %1547 = vadd.xlane.f32.xlu1 %v1546_v42  ;;  %v1383_v48 = vpop.xlane.xlu0 %1382  ;;  %v1549_v5 = vsel %vm1296_vm2, %v3036_v50, 0.0 }
 0x364   : > { %1544 = vadd.xlane.f32.xlu0 %v1543_v63  ;;  %v1421_v38 = vsub.f32 %v2907_v49, %v1383_v48  ;;  %2355 = vpow2.f32 %v1477_v58 }
 0x365   : > { %v3039_v53 = vpop.eup %2345  ;;  %v1479_v34 = vmul.f32 1.442695, %v1420_v31 }
 0x366   : > { %v1481_v0 = vmul.f32 1.442695, %v1421_v38  ;;  %v1386_v54 = vpop.xlane.xlu1 %1385  ;;  %v1552_v39 = vsel %vm1296_vm2, %v3039_v53, 0.0  ;;  %v3046_v1 = vpop.eup %2347 }
 0x367   : > { %2357 = vpow2.f32 %v1479_v34  ;;  %v1422_v41 = vsub.f32 %v2910_v10, %v1386_v54  ;;  %1553 = vadd.xlane.f32.xlu1 %v1552_v39  ;;  %v1389_v62 = vpop.xlane.xlu0 %1388  ;;  %v1555_v12 = vsel %vm1296_vm2, %v3046_v1, 0.0 }
 0x368   : > { %1550 = vadd.xlane.f32.xlu0 %v1549_v5  ;;  %v1423_v49 = vsub.f32 %v2920_v59, %v1389_v62  ;;  %2359 = vpow2.f32 %v1481_v0 }
 0x369   : > { %v3049_v40 = vpop.eup %2349  ;;  %v1483_v2 = vmul.f32 1.442695, %v1422_v41 }
 0x36a   : > { %v1485_v6 = vmul.f32 1.442695, %v1423_v49  ;;  %v1392_v4 = vpop.xlane.xlu1 %1391  ;;  %v1558_v46 = vsel %vm1296_vm2, %v3049_v40, 0.0  ;;  %v3056_v9 = vpop.eup %2351 }
 0x36b   : > { %2361 = vpow2.f32 %v1483_v2  ;;  %v1424_v10 = vsub.f32 %v2917_v55, %v1392_v4  ;;  %1559 = vadd.xlane.f32.xlu1 %v1558_v46  ;;  %v1561_v16 = vsel %vm1296_vm2, %v3056_v9, 0.0 }
 0x36c   : > { %1556 = vadd.xlane.f32.xlu0 %v1555_v12  ;;  %2363 = vpow2.f32 %v1485_v6 }
 0x36d   : > { %v3058_v59 = vpop.eup %2353  ;;  %v1487_v11 = vmul.f32 1.442695, %v1424_v10 }
 0x36e   : > { %v1564_v47 = vsel %vm1296_vm2, %v3058_v59, 0.0  ;;  %v3064_v55 = vpop.eup %2355 }
 0x36f   : > { %2365 = vpow2.f32 %v1487_v11  ;;  %1565 = vadd.xlane.f32.xlu1 %v1564_v47  ;;  %v1567_v20 = vsel %vm1296_vm2, %v3064_v55, 0.0 }
 0x370   : > { %1562 = vadd.xlane.f32.xlu0 %v1561_v16 }
 0x371   : > { %v3066_v13 = vpop.eup %2357 }
 0x372   : > { %v1570_v51 = vsel %vm1296_vm2, %v3066_v13, 0.0  ;;  %v3072_v15 = vpop.eup %2359 }
 0x373   : > { %1571 = vadd.xlane.f32.xlu1 %v1570_v51  ;;  %v1573_v27 = vsel %vm1296_vm2, %v3072_v15, 0.0 }
 0x374   : > { %1568 = vadd.xlane.f32.xlu0 %v1567_v20 }
 0x375   : > { %v3074_v26 = vpop.eup %2361 }
 0x376   : > { %v1576_v52 = vsel %vm1296_vm2, %v3074_v26, 0.0  ;;  %v3080_v29 = vpop.eup %2363 }
 0x377   : > { %1577 = vadd.xlane.f32.xlu1 %v1576_v52  ;;  %v1579_v35 = vsel %vm1296_vm2, %v3080_v29, 0.0 }
 0x378   : > { %1574 = vadd.xlane.f32.xlu0 %v1573_v27 }
 0x379   : > { %v3082_v24 = vpop.eup %2365 }
 0x37a   : > { %v1582_v57 = vsel %vm1296_vm2, %v3082_v24, 0.0 }
 0x37b   : > { %1583 = vadd.xlane.f32.xlu1 %v1582_v57 }
 0x37c   : > { %1580 = vadd.xlane.f32.xlu0 %v1579_v35 }
 0x3c8   : > { %v1494_v30 = vpop.xlane.xlu1 %1493 }
 0x3c9   : > { %2367 = vrcp.f32 %v1494_v30 }
 0x3cc   : > { %v1500_v23 = vpop.xlane.xlu1 %1499 }
 0x3cd   : > { %2369 = vrcp.f32 %v1500_v23  ;;  %v1491_v58 = vpop.xlane.xlu0 %1490 }
 0x3ce   : > { %2371 = vrcp.f32 %v1491_v58 }
 0x3d1   : > { %v1497_v37 = vpop.xlane.xlu0 %1496 }
 0x3d2   : > { %2373 = vrcp.f32 %v1497_v37 }
 0x3d3   : > { %v2368_v42 = vpop.eup %2367 }
 0x3d4   : > { %v1618_v31 = vmul.f32 %v2368_v42, %v1494_v30  ;;  %v1506_v63 = vpop.xlane.xlu1 %1505 }
 0x3d5   : > { %2375 = vrcp.f32 %v1506_v63  ;;  %v1503_v48 = vpop.xlane.xlu0 %1502 }
 0x3d6   : > { %v1650_v38 = vsub.f32 2.0, %v1618_v31  ;;  %2377 = vrcp.f32 %v1503_v48 }
 0x3d7   : > { %v2370_v34 = vpop.eup %2369 }
 0x3d8   : > { %v2372_v0 = vpop.eup %2371  ;;  %v1682_v54 = vmul.f32 %v2368_v42, %v1650_v38  ;;  %v1620_v39 = vmul.f32 %v2370_v34, %v1500_v23  ;;  %v1512_v41 = vpop.xlane.xlu1 %1511 }
 0x3d9   : > { %v1617_v5 = vmul.f32 %v2372_v0, %v1491_v58  ;;  %2379 = vrcp.f32 %v1512_v41  ;;  %v1509_v62 = vpop.xlane.xlu0 %1508 }
 0x3da   : > { %v1714_v49 = vmul.f32 %v2935_v18, %v1682_v54  ;;  %v1652_v2 = vsub.f32 2.0, %v1620_v39  ;;  %2381 = vrcp.f32 %v1509_v62 }
 0x3db   : > { %v1649_v6 = vsub.f32 2.0, %v1617_v5 }
 0x3dc   : > { %v2374_v4 = vpop.eup %2373  ;;  %1746 = vst.msk [vmem:[%s3093_s11 + $0x8] sm:$0xff] %vm1296_vm2, %v1714_v49  ;;  %v1684_v46 = vmul.f32 %v2370_v34, %v1652_v2  ;;  %v1518_v10 = vpop.xlane.xlu1 %1517 }
 0x3dd   : > { %v1681_v12 = vmul.f32 %v2372_v0, %v1649_v6  ;;  %v1619_v11 = vmul.f32 %v2374_v4, %v1497_v37  ;;  %2383 = vrcp.f32 %v1518_v10  ;;  %v1515_v47 = vpop.xlane.xlu0 %1514 }
 0x3de   : > { %v1716_v16 = vmul.f32 %v2941_v28, %v1684_v46  ;;  %2385 = vrcp.f32 %v1515_v47 }
 0x3df   : > { %v2376_v51 = vpop.eup %2375  ;;  %v1713_v18 = vmul.f32 %v2943_v33, %v1681_v12  ;;  %v1651_v20 = vsub.f32 2.0, %v1619_v11 }
 0x3e0   : > { %v2378_v52 = vpop.eup %2377  ;;  %1748 = vst.msk [vmem:[%s3093_s11 + $0x18] sm:$0xff] %vm1296_vm2, %v1716_v16  ;;  %v1622_v27 = vmul.f32 %v2376_v51, %v1506_v63  ;;  %v1524_v57 = vpop.xlane.xlu1 %1523 }
 0x3e1   : > { %1745 = vst.msk [vmem:[%s3093_s11] sm:$0xff] %vm1296_vm2, %v1713_v18  ;;  %v1683_v35 = vmul.f32 %v2374_v4, %v1651_v20  ;;  %v1621_v30 = vmul.f32 %v2378_v52, %v1503_v48  ;;  %2387 = vrcp.f32 %v1524_v57  ;;  %v1521_v23 = vpop.xlane.xlu0 %1520 }
 0x3e2   : > { %v1654_v58 = vsub.f32 2.0, %v1622_v27  ;;  %2389 = vrcp.f32 %v1521_v23 }
 0x3e3   : > { %v2380_v28 = vpop.eup %2379  ;;  %v1715_v37 = vmul.f32 %v2951_v56, %v1683_v35  ;;  %v1653_v42 = vsub.f32 2.0, %v1621_v30 }
 0x3e4   : > { %v2382_v33 = vpop.eup %2381  ;;  %v1686_v31 = vmul.f32 %v2376_v51, %v1654_v58  ;;  %v1624_v38 = vmul.f32 %v2380_v28, %v1512_v41  ;;  %v1530_v34 = vpop.xlane.xlu1 %1529 }
 0x3e5   : > { %1747 = vst.msk [vmem:[%s3093_s11 + $0x10] sm:$0xff] %vm1296_vm2, %v1715_v37  ;;  %v1685_v63 = vmul.f32 %v2378_v52, %v1653_v42  ;;  %v1623_v0 = vmul.f32 %v2382_v33, %v1509_v62  ;;  %2391 = vrcp.f32 %v1530_v34  ;;  %v1527_v48 = vpop.xlane.xlu0 %1526 }
 0x3e6   : > { %v1718_v54 = vmul.f32 %v2959_v7, %v1686_v31  ;;  %v1656_v39 = vsub.f32 2.0, %v1624_v38  ;;  %2393 = vrcp.f32 %v1527_v48 }
 0x3e7   : > { %v2384_v5 = vpop.eup %2383  ;;  %v1717_v56 = vmul.f32 %v2956_v3, %v1685_v63  ;;  %v1655_v49 = vsub.f32 2.0, %v1623_v0 }
 0x3e8   : > { %v2386_v2 = vpop.eup %2385  ;;  %1750 = vst.msk [vmem:[%s3093_s11 + $0x28] sm:$0xff] %vm1296_vm2, %v1718_v54  ;;  %v1688_v41 = vmul.f32 %v2380_v28, %v1656_v39  ;;  %v1626_v6 = vmul.f32 %v2384_v5, %v1518_v10  ;;  %v1536_v4 = vpop.xlane.xlu1 %1535 }
 0x3e9   : > { %1749 = vst.msk [vmem:[%s3093_s11 + $0x20] sm:$0xff] %vm1296_vm2, %v1717_v56  ;;  %v1687_v62 = vmul.f32 %v2382_v33, %v1655_v49  ;;  %v1625_v46 = vmul.f32 %v2386_v2, %v1515_v47  ;;  %2395 = vrcp.f32 %v1536_v4  ;;  %v1533_v7 = vpop.xlane.xlu0 %1532 }
 0x3ea   : > { %v1720_v12 = vmul.f32 %v2969_v19, %v1688_v41  ;;  %v1658_v11 = vsub.f32 2.0, %v1626_v6  ;;  %2397 = vrcp.f32 %v1533_v7 }
 0x3eb   : > { %v2388_v3 = vpop.eup %2387  ;;  %v1719_v16 = vmul.f32 %v2966_v44, %v1687_v62  ;;  %v1657_v51 = vsub.f32 2.0, %v1625_v46 }
 0x3ec   : > { %v2390_v18 = vpop.eup %2389  ;;  %1752 = vst.msk [vmem:[%s3093_s11 + $0x38] sm:$0xff] %vm1296_vm2, %v1720_v12  ;;  %v1690_v10 = vmul.f32 %v2384_v5, %v1658_v11  ;;  %v1628_v20 = vmul.f32 %v2388_v3, %v1524_v57  ;;  %v1542_v52 = vpop.xlane.xlu1 %1541 }
 0x3ed   : > { %1751 = vst.msk [vmem:[%s3093_s11 + $0x30] sm:$0xff] %vm1296_vm2, %v1719_v16  ;;  %v1689_v47 = vmul.f32 %v2386_v2, %v1657_v51  ;;  %v1627_v27 = vmul.f32 %v2390_v18, %v1521_v23  ;;  %2399 = vrcp.f32 %v1542_v52  ;;  %v1539_v19 = vpop.xlane.xlu0 %1538 }
 0x3ee   : > { %v1722_v35 = vmul.f32 %v2979_v32, %v1690_v10  ;;  %v1660_v30 = vsub.f32 2.0, %v1628_v20  ;;  %2401 = vrcp.f32 %v1539_v19 }
 0x3ef   : > { %v2392_v44 = vpop.eup %2391  ;;  %v1721_v58 = vmul.f32 %v2976_v21, %v1689_v47  ;;  %v1659_v28 = vsub.f32 2.0, %v1627_v27 }
 0x3f0   : > { %v2394_v37 = vpop.eup %2393  ;;  %1754 = vst.msk [vmem:[%s3093_s11 + $0x48] sm:$0xff] %vm1296_vm2, %v1722_v35  ;;  %v1692_v57 = vmul.f32 %v2388_v3, %v1660_v30  ;;  %v1630_v42 = vmul.f32 %v2392_v44, %v1530_v34  ;;  %v1548_v33 = vpop.xlane.xlu1 %1547 }
 0x3f1   : > { %1753 = vst.msk [vmem:[%s3093_s11 + $0x40] sm:$0xff] %vm1296_vm2, %v1721_v58  ;;  %v1691_v23 = vmul.f32 %v2390_v18, %v1659_v28  ;;  %v1629_v31 = vmul.f32 %v2394_v37, %v1527_v48  ;;  %2403 = vrcp.f32 %v1548_v33  ;;  %v1545_v32 = vpop.xlane.xlu0 %1544 }
 0x3f2   : > { %v1724_v38 = vmul.f32 %v2989_v45, %v1692_v57  ;;  %v1662_v63 = vsub.f32 2.0, %v1630_v42  ;;  %2405 = vrcp.f32 %v1545_v32 }
 0x3f3   : > { %v2396_v21 = vpop.eup %2395  ;;  %v1723_v0 = vmul.f32 %v2986_v43, %v1691_v23  ;;  %v1661_v54 = vsub.f32 2.0, %v1629_v31 }
 0x3f4   : > { %v2398_v39 = vpop.eup %2397  ;;  %1756 = vst.msk [vmem:[%s3093_s11 + $0x58] sm:$0xff] %vm1296_vm2, %v1724_v38  ;;  %v1694_v34 = vmul.f32 %v2392_v44, %v1662_v63  ;;  %v1632_v5 = vmul.f32 %v2396_v21, %v1536_v4  ;;  %v1554_v56 = vpop.xlane.xlu1 %1553 }
 0x3f5   : > { %1755 = vst.msk [vmem:[%s3093_s11 + $0x50] sm:$0xff] %vm1296_vm2, %v1723_v0  ;;  %v1693_v48 = vmul.f32 %v2394_v37, %v1661_v54  ;;  %v1631_v49 = vmul.f32 %v2398_v39, %v1533_v7  ;;  %2407 = vrcp.f32 %v1554_v56  ;;  %v1551_v45 = vpop.xlane.xlu0 %1550 }
 0x3f6   : > { %v1726_v2 = vmul.f32 %v2999_v61, %v1694_v34  ;;  %v1664_v41 = vsub.f32 2.0, %v1632_v5  ;;  %2409 = vrcp.f32 %v1551_v45 }
 0x3f7   : > { %v2400_v43 = vpop.eup %2399  ;;  %v1725_v6 = vmul.f32 %v2996_v60, %v1693_v48  ;;  %v1663_v62 = vsub.f32 2.0, %v1631_v49 }
 0x3f8   : > { %v2402_v46 = vpop.eup %2401  ;;  %1758 = vst.msk [vmem:[%s3093_s11 + $0x68] sm:$0xff] %vm1296_vm2, %v1726_v2  ;;  %v1696_v4 = vmul.f32 %v2396_v21, %v1664_v41  ;;  %v1634_v12 = vmul.f32 %v2400_v43, %v1542_v52  ;;  %v1560_v11 = vpop.xlane.xlu1 %1559 }
 0x3f9   : > { %1757 = vst.msk [vmem:[%s3093_s11 + $0x60] sm:$0xff] %vm1296_vm2, %v1725_v6  ;;  %v1695_v7 = vmul.f32 %v2398_v39, %v1663_v62  ;;  %v1633_v3 = vmul.f32 %v2402_v46, %v1539_v19  ;;  %2411 = vrcp.f32 %v1560_v11  ;;  %v1557_v61 = vpop.xlane.xlu0 %1556 }
 0x3fa   : > { %v1728_v16 = vmul.f32 %v3009_v8, %v1696_v4  ;;  %v1666_v51 = vsub.f32 2.0, %v1634_v12  ;;  %2413 = vrcp.f32 %v1557_v61 }
 0x3fb   : > { %v2404_v60 = vpop.eup %2403  ;;  %v1727_v18 = vmul.f32 %v3006_v14, %v1695_v7  ;;  %v1665_v10 = vsub.f32 2.0, %v1633_v3 }
 0x3fc   : > { %v2406_v20 = vpop.eup %2405  ;;  %1760 = vst.msk [vmem:[%s3093_s11 + $0x78] sm:$0xff] %vm1296_vm2, %v1728_v16  ;;  %v1698_v52 = vmul.f32 %v2400_v43, %v1666_v51  ;;  %v1636_v47 = vmul.f32 %v2404_v60, %v1548_v33  ;;  %v1566_v27 = vpop.xlane.xlu1 %1565 }
 0x3fd   : > { %1759 = vst.msk [vmem:[%s3093_s11 + $0x70] sm:$0xff] %vm1296_vm2, %v1727_v18  ;;  %v1697_v19 = vmul.f32 %v2402_v46, %v1665_v10  ;;  %v1635_v35 = vmul.f32 %v2406_v20, %v1545_v32  ;;  %2415 = vrcp.f32 %v1566_v27  ;;  %v1563_v8 = vpop.xlane.xlu0 %1562 }
 0x3fe   : > { %v1730_v30 = vmul.f32 %v3019_v17, %v1698_v52  ;;  %v1668_v44 = vsub.f32 2.0, %v1636_v47  ;;  %2417 = vrcp.f32 %v1563_v8 }
 0x3ff   : > { %v2408_v14 = vpop.eup %2407  ;;  %v1729_v58 = vmul.f32 %v3016_v25, %v1697_v19  ;;  %v1667_v28 = vsub.f32 2.0, %v1635_v35 }
 0x400   : > { %v2410_v37 = vpop.eup %2409  ;;  %1762 = vst.msk [vmem:[%s3093_s11 + $0x88] sm:$0xff] %vm1296_vm2, %v1730_v30  ;;  %v1700_v57 = vmul.f32 %v2404_v60, %v1668_v44  ;;  %v1638_v42 = vmul.f32 %v2408_v14, %v1554_v56  ;;  %v1572_v33 = vpop.xlane.xlu1 %1571 }
 0x401   : > { %1761 = vst.msk [vmem:[%s3093_s11 + $0x80] sm:$0xff] %vm1296_vm2, %v1729_v58  ;;  %v1699_v23 = vmul.f32 %v2406_v20, %v1667_v28  ;;  %v1637_v31 = vmul.f32 %v2410_v37, %v1551_v45  ;;  %2419 = vrcp.f32 %v1572_v33  ;;  %v1569_v17 = vpop.xlane.xlu0 %1568 }
 0x402   : > { %v1732_v32 = vmul.f32 %v3029_v22, %v1700_v57  ;;  %v1670_v38 = vsub.f32 2.0, %v1638_v42  ;;  %2421 = vrcp.f32 %v1569_v17 }
 0x403   : > { %v2412_v25 = vpop.eup %2411  ;;  %v1731_v63 = vmul.f32 %v3026_v36, %v1699_v23  ;;  %v1669_v21 = vsub.f32 2.0, %v1637_v31 }
 0x404   : > { %v2414_v0 = vpop.eup %2413  ;;  %1764 = vst.msk [vmem:[%s3093_s11 + $0x98] sm:$0xff] %vm1296_vm2, %v1732_v32  ;;  %v1702_v54 = vmul.f32 %v2408_v14, %v1670_v38  ;;  %v1640_v39 = vmul.f32 %v2412_v25, %v1560_v11  ;;  %v1578_v34 = vpop.xlane.xlu1 %1577 }
 0x405   : > { %1763 = vst.msk [vmem:[%s3093_s11 + $0x90] sm:$0xff] %vm1296_vm2, %v1731_v63  ;;  %v1701_v5 = vmul.f32 %v2410_v37, %v1669_v21  ;;  %v1639_v56 = vmul.f32 %v2414_v0, %v1557_v61  ;;  %2423 = vrcp.f32 %v1578_v34  ;;  %v1575_v22 = vpop.xlane.xlu0 %1574 }
 0x406   : > { %v1734_v48 = vmul.f32 %v3039_v53, %v1702_v54  ;;  %v1672_v49 = vsub.f32 2.0, %v1640_v39  ;;  %2425 = vrcp.f32 %v1575_v22 }
 0x407   : > { %v2416_v36 = vpop.eup %2415  ;;  %v1733_v45 = vmul.f32 %v3036_v50, %v1701_v5  ;;  %v1671_v2 = vsub.f32 2.0, %v1639_v56 }
 0x408   : > { %v2418_v41 = vpop.eup %2417  ;;  %1766 = vst.msk [vmem:[%s3093_s11 + $0xa8] sm:$0xff] %vm1296_vm2, %v1734_v48  ;;  %v1704_v43 = vmul.f32 %v2412_v25, %v1672_v49  ;;  %v1642_v6 = vmul.f32 %v2416_v36, %v1566_v27  ;;  %v1584_v62 = vpop.xlane.xlu1 %1583 }
 0x409   : > { %1765 = vst.msk [vmem:[%s3093_s11 + $0xa0] sm:$0xff] %vm1296_vm2, %v1733_v45  ;;  %v1703_v46 = vmul.f32 %v2414_v0, %v1671_v2  ;;  %v1641_v4 = vmul.f32 %v2418_v41, %v1563_v8  ;;  %2427 = vrcp.f32 %v1584_v62  ;;  %v1581_v53 = vpop.xlane.xlu0 %1580 }
 0x40a   : > { %v1736_v12 = vmul.f32 %v3049_v40, %v1704_v43  ;;  %v1674_v11 = vsub.f32 2.0, %v1642_v6  ;;  %2429 = vrcp.f32 %v1581_v53 }
 0x40b   : > { %v2420_v50 = vpop.eup %2419  ;;  %v1735_v7 = vmul.f32 %v3046_v1, %v1703_v46  ;;  %v1673_v3 = vsub.f32 2.0, %v1641_v4 }
 0x40c   : > { %v2422_v61 = vpop.eup %2421  ;;  %1768 = vst.msk [vmem:[%s3093_s11 + $0xb8] sm:$0xff] %vm1296_vm2, %v1736_v12  ;;  %v1706_v16 = vmul.f32 %v2416_v36, %v1674_v11  ;;  %v1644_v51 = vmul.f32 %v2420_v50, %v1572_v33 }
 0x40d   : > { %1767 = vst.msk [vmem:[%s3093_s11 + $0xb0] sm:$0xff] %vm1296_vm2, %v1735_v7  ;;  %v1705_v60 = vmul.f32 %v2418_v41, %v1673_v3  ;;  %v1643_v18 = vmul.f32 %v2422_v61, %v1569_v17 }
 0x40e   : > { %v1738_v10 = vmul.f32 %v3058_v59, %v1706_v16  ;;  %v1676_v40 = vsub.f32 2.0, %v1644_v51 }
 0x40f   : > { %v2424_v20 = vpop.eup %2423  ;;  %v1737_v52 = vmul.f32 %v3056_v9, %v1705_v60  ;;  %v1675_v47 = vsub.f32 2.0, %v1643_v18 }
 0x410   : > { %v2426_v1 = vpop.eup %2425  ;;  %1770 = vst.msk [vmem:[%s3093_s11 + $0xc8] sm:$0xff] %vm1296_vm2, %v1738_v10  ;;  %v1708_v27 = vmul.f32 %v2420_v50, %v1676_v40  ;;  %v1646_v19 = vmul.f32 %v2424_v20, %v1578_v34 }
 0x411   : > { %1769 = vst.msk [vmem:[%s3093_s11 + $0xc0] sm:$0xff] %vm1296_vm2, %v1737_v52  ;;  %v1707_v35 = vmul.f32 %v2422_v61, %v1675_v47  ;;  %v1645_v8 = vmul.f32 %v2426_v1, %v1575_v22 }
 0x412   : > { %v1740_v30 = vmul.f32 %v3066_v13, %v1708_v27  ;;  %v1678_v59 = vsub.f32 2.0, %v1646_v19 }
 0x413   : > { %v2428_v44 = vpop.eup %2427  ;;  %v1739_v14 = vmul.f32 %v3064_v55, %v1707_v35  ;;  %v1677_v9 = vsub.f32 2.0, %v1645_v8 }
 0x414   : > { %v2430_v58 = vpop.eup %2429  ;;  %1772 = vst.msk [vmem:[%s3093_s11 + $0xd8] sm:$0xff] %vm1296_vm2, %v1740_v30  ;;  %v1710_v28 = vmul.f32 %v2424_v20, %v1678_v59  ;;  %v1648_v37 = vmul.f32 %v2428_v44, %v1584_v62 }
 0x415   : > { %1771 = vst.msk [vmem:[%s3093_s11 + $0xd0] sm:$0xff] %vm1296_vm2, %v1739_v14  ;;  %v1709_v57 = vmul.f32 %v2426_v1, %v1677_v9  ;;  %v1647_v42 = vmul.f32 %v2430_v58, %v1581_v53 }
 0x416   : > { %v1742_v13 = vmul.f32 %v3074_v26, %v1710_v28  ;;  %v1680_v33 = vsub.f32 2.0, %v1648_v37 }
 0x417   : > { %v1741_v23 = vmul.f32 %v3072_v15, %v1709_v57  ;;  %v1679_v31 = vsub.f32 2.0, %v1647_v42 }
 0x418   : > { %1774 = vst.msk [vmem:[%s3093_s11 + $0xe8] sm:$0xff] %vm1296_vm2, %v1742_v13  ;;  %v1712_v55 = vmul.f32 %v2428_v44, %v1680_v33 }
 0x419   : > { %1773 = vst.msk [vmem:[%s3093_s11 + $0xe0] sm:$0xff] %vm1296_vm2, %v1741_v23  ;;  %v1711_v17 = vmul.f32 %v2430_v58, %v1679_v31 }
 0x41a   : > { %v1744_v32 = vmul.f32 %v3082_v24, %v1712_v55 }
 0x41b   : > { %v1743_v38 = vmul.f32 %v3080_v29, %v1711_v17 }
 0x41c   : > { %1776 = vst.msk [vmem:[%s3093_s11 + $0xf8] sm:$0xff] %vm1296_vm2, %v1744_v32 }
 0x41d   : > { %1775 = vst.msk [vmem:[%s3093_s11 + $0xf0] sm:$0xff] %vm1296_vm2, %v1743_v38 }
 0x41e PF: > { %s17_s24 = sadd.s32 1, %s2437_s24  }
 0x41f   : > { %p14_p4 = scmp.ge.s32.totalorder %s17_s24, 4  }
 0x421   :  { %16 = sbr.rel (!%p14_p4) target bundleno = 1 (0x1), region = 78 }

</bundles_post_ra>
